<compile_context>
chip_gen: v7x
topology: tpu7x:2x2x1
jax: 0.10.0
libtpu: 0.0.40
codegen_flags: <defaults>
</compile_context>

<pallas_src>
import jax
import jax.numpy as jnp
from jax.experimental import pallas as pl
from jax.experimental.pallas import tpu as pltpu


# ----------------------------- configuration -------------------------------

B = 2            # batch
C_IN = 4         # input channels (stacked frames)
H = W = 16       # input spatial size
NF = 8           # conv feature maps
OUT_DIM = 32     # projection out_dim
LN_EPS = 1e-5

H1 = W1 = 7      # after 3x3 stride-2 conv (VALID)
H2 = W2 = 5      # after 3x3 stride-1 conv
H3 = W3 = 3      # after 3x3 stride-1 conv (head)
FLAT = NF * H3 * W3   # 72

PER = H // 2           # per-image row period in the stacked layout (8)
R1 = B * PER - 1       # conv1 output rows (valid rows at b*PER .. b*PER+H1-1)
R2 = R1 - 2            # conv2 output rows
R3 = R1 - 4            # conv3 output rows

# MXU operand dtype for the conv GEMMs (accumulation is always f32).
MXU_DTYPE = jnp.bfloat16

_VMEM = pl.BlockSpec(memory_space=pltpu.MemorySpace.VMEM)


# ----------------------------- fused kernel --------------------------------

def _conv3x3(get_patch, w_ref, bias):
    """3x3 conv + bias + ReLU over the stacked (rows, w*c) layout.

    get_patch(i, j) returns the (R, Wo*Cin) stride-1 shifted window (already
    in MXU_DTYPE) covering ALL images at once; w_ref[i*3+j] is the matching
    (Wo*Cin, Wo*Cout) block-diagonal GEMM weight.  One dot per tap, f32 acc.
    """
    acc = None
    for t in range(9):
        i, j = t // 3, t % 3
        d = jnp.dot(get_patch(i, j), w_ref[t],
                    preferred_element_type=jnp.float32)
        acc = d if acc is None else acc + d
    return jnp.maximum(acc + bias, 0.0)


def _encoder_kernel(ph_ref, w1_ref, w2_ref, w3_ref, wp_ref, bvec_ref, o_ref):
    bv = bvec_ref[...]                              # (6, 56) f32, packed biases

    # ---- shared_cnn conv1: 3x3 stride 2 + ReLU ------------------------------
    # Stride-2 sampling was decomposed into 4 phase planes outside (bf16, with
    # the 1/255 normalization folded into w1), so every tap is a plain
    # stride-1 slice and ONE batched GEMM of shape (R1, 28) @ (28, 56).
    planes = [ph_ref[k] for k in range(4)]          # each (B*PER, (W//2)*C_IN)

    def patch1(i, j):
        p, di = i % 2, i // 2
        q, dj = j % 2, j // 2
        return planes[p * 2 + q][di: di + R1,
                                 dj * C_IN: dj * C_IN + W1 * C_IN]

    a1 = _conv3x3(patch1, w1_ref, bv[0:1, :W1 * NF])          # (R1, 56) f32

    # ---- shared_cnn conv2: 3x3 stride 1 + ReLU ------------------------------
    a1b = a1.astype(MXU_DTYPE)                                # cast once/layer
    a2 = _conv3x3(lambda i, j: a1b[i: i + R2, j * NF: j * NF + W2 * NF],
                  w2_ref, bv[1:2, :W2 * NF])                  # (R2, 40) f32

    # ---- head_cnn conv3: 3x3 stride 1 + ReLU --------------------------------
    a2b = a2.astype(MXU_DTYPE)
    a3 = _conv3x3(lambda i, j: a2b[i: i + R3, j * NF: j * NF + W3 * NF],
                  w3_ref, bv[2:3, :W3 * NF])                  # (R3, 24) f32

    # ---- projection: Linear (+bias), flatten folded into packed wp ----------
    # wp was pre-permuted to (h, w, c) row order; three full-M f32 GEMMs over
    # every row of a3, then a row-shift-and-add aligns the 3 per-h partial
    # sums so that row b*PER holds image b's projection (no M=1 dots).
    Pm = [jnp.dot(a3, wp_ref[r], preferred_element_type=jnp.float32)
          for r in range(H3)]                                 # each (R3, 32)
    Q = Pm[0][0:R3 - 2, :] + Pm[1][1:R3 - 1, :] + Pm[2][2:R3, :]
    h = jnp.concatenate([Q[b * PER: b * PER + 1, :] for b in range(B)], axis=0)
    h = h + bv[3:4, :OUT_DIM]                                 # (B, 32)

    # ---- LayerNorm (two-pass, exact) + tanh, all f32 ------------------------
    inv_n = jnp.float32(1.0 / OUT_DIM)
    mean = jnp.sum(h, axis=-1, keepdims=True) * inv_n
    xc = h - mean
    var = jnp.sum(xc * xc, axis=-1, keepdims=True) * inv_n
    y = xc * jax.lax.rsqrt(var + LN_EPS)
    o_ref[...] = jnp.tanh(y * bv[4:5, :OUT_DIM] + bv[5:6, :OUT_DIM])


# ----------------------------- host-side packing ---------------------------

def _blockdiag(w, wo):
    """(3,3,Cin,Cout) conv weight -> (9, wo*Cin, wo*Cout) block-diagonal GEMM
    weights so the conv over the (rows, w*c) layout is 9 plain matmuls.
    TODO(synk): replace with true im2col (K=9*Cin) at real module sizes."""
    k1, k2, cin, cout = w.shape
    eye = jnp.eye(wo, dtype=jnp.float32)
    bd = jnp.einsum('ab,kio->kaibo', eye, w.reshape(k1 * k2, cin, cout))
    return bd.reshape(k1 * k2, wo * cin, wo * cout)


def pack_params(params):
    """One-time repacking of module parameters into kernel-friendly layouts."""
    # Projection rows reordered from PyTorch (c,h,w) flatten to (h, w, c).
    wp = params["wp"].reshape(NF, H3, W3, OUT_DIM).transpose(1, 2, 0, 3)

    # All small vectors packed into a single (6, 56) f32 operand.
    bvec = jnp.zeros((6, W1 * NF), jnp.float32)
    bvec = bvec.at[0, :W1 * NF].set(jnp.tile(params["b1"], W1))
    bvec = bvec.at[1, :W2 * NF].set(jnp.tile(params["b2"], W2))
    bvec = bvec.at[2, :W3 * NF].set(jnp.tile(params["b3"], W3))
    bvec = bvec.at[3, :OUT_DIM].set(params["bp"])
    bvec = bvec.at[4, :OUT_DIM].set(params["gamma"])
    bvec = bvec.at[5, :OUT_DIM].set(params["beta"])

    return dict(
        # NormalizeImg (x/255) folded into w1.
        w1=_blockdiag(params["w1"] * (1.0 / 255.0), W1).astype(MXU_DTYPE),
        w2=_blockdiag(params["w2"], W2).astype(MXU_DTYPE),
        w3=_blockdiag(params["w3"], W3).astype(MXU_DTYPE),
        wp=wp.reshape(H3, W3 * NF, OUT_DIM).astype(jnp.float32),   # (3,24,32)
        bvec=bvec,
    )


def _phase_stack(x_nchw):
    """NCHW -> NHWC, then the 4 stride-2 phase planes stacked into a single
    bf16 operand of shape (4, B*H/2, (W/2)*C) so the stride-2 conv becomes
    stride-1 inside the kernel (and input DMA bytes are halved)."""
    x = jnp.transpose(x_nchw, (0, 2, 3, 1)).astype(jnp.float32)    # (B,H,W,C)
    planes = [x[:, p::2, q::2, :].reshape(B * PER, (W // 2) * C_IN)
              for p in (0, 1) for q in (0, 1)]
    return jnp.stack(planes, axis=0).astype(MXU_DTYPE)


# ----------------------------- Encoder forward -----------------------------

def encoder_forward(x_nchw, packed, detach=False):
    assert x_nchw.shape == (B, C_IN, H, W), x_nchw.shape
    # `detach` only affects autodiff; the forward value is identical.
    del detach
    phases = _phase_stack(x_nchw)
    return pl.pallas_call(
        _encoder_kernel,
        out_shape=jax.ShapeDtypeStruct((B, OUT_DIM), jnp.float32),
        in_specs=[_VMEM] * 6,
        out_specs=_VMEM,
    )(phases, packed["w1"], packed["w2"], packed["w3"],
      packed["wp"], packed["bvec"])


# ----------------------------- reference & params --------------------------

def encoder_reference(x_nchw, params):
    """Pure-JAX/XLA reference of the PyTorch forward pass (for self-check)."""
    x = jnp.transpose(x_nchw, (0, 2, 3, 1)).astype(jnp.float32) / 255.0

    def conv(x, w, b, s):
        y = jax.lax.conv_general_dilated(
            x, w, (s, s), "VALID",
            dimension_numbers=("NHWC", "HWIO", "NHWC"))
        return jnp.maximum(y + b, 0.0)

    x = conv(x, params["w1"], params["b1"], 2)
    x = conv(x, params["w2"], params["b2"], 1)
    x = conv(x, params["w3"], params["b3"], 1)
    x = jnp.transpose(x, (0, 3, 1, 2)).reshape(x.shape[0], -1)   # (C,H,W) flat
    h = x @ params["wp"] + params["bp"]
    mean = jnp.mean(h, axis=-1, keepdims=True)
    var = jnp.mean(jnp.square(h - mean), axis=-1, keepdims=True)
    hn = (h - mean) * jax.lax.rsqrt(var + LN_EPS)
    return jnp.tanh(hn * params["gamma"] + params["beta"])


def init_params(key, c_in=C_IN, nf=NF, flat_dim=FLAT, out_dim=OUT_DIM):
    ks = jax.random.split(key, 8)
    scale = 0.1
    return {
        "w1": scale * jax.random.normal(ks[0], (3, 3, c_in, nf), jnp.float32),
        "b1": scale * jax.random.normal(ks[1], (nf,), jnp.float32),
        "w2": scale * jax.random.normal(ks[2], (3, 3, nf, nf), jnp.float32),
        "b2": scale * jax.random.normal(ks[3], (nf,), jnp.float32),
        "w3": scale * jax.random.normal(ks[4], (3, 3, nf, nf), jnp.float32),
        "b3": scale * jax.random.normal(ks[5], (nf,), jnp.float32),
        "wp": scale * jax.random.normal(ks[6], (flat_dim, out_dim), jnp.float32),
        "bp": scale * jax.random.normal(ks[7], (out_dim,), jnp.float32),
        "gamma": jnp.ones((out_dim,), jnp.float32),   # nn.LayerNorm defaults
        "beta": jnp.zeros((out_dim,), jnp.float32),
    }


# ----------------------------- main -----------------------------------------

if __name__ == "__main__":
    key = jax.random.PRNGKey(0)
    k_x, k_p = jax.random.split(key)

    # x: [B, C, H, W] = [2, 4, 16, 16], pixel-like values in [0, 255)
    x = jax.random.uniform(k_x, (B, C_IN, H, W), jnp.float32, 0.0, 255.0)
    params = init_params(k_p)
    packed = pack_params(params)            # one-time weight repacking

    fwd = jax.jit(encoder_forward)
    out = jax.block_until_ready(fwd(x, packed))

    assert out.shape == (B, OUT_DIM), out.shape
    assert bool(jnp.all(jnp.isfinite(out)))

    # Sanity-check the fused kernel against the pure-JAX reference
    # (bf16 MXU operands/inputs -> loose tolerance).
    ref = jax.block_until_ready(encoder_reference(x, params))
    assert float(jnp.max(jnp.abs(out - ref))) < 0.1

    print("KERNEL_OK")
</pallas_src>

<mosaic_0001>
module attributes {stable_mosaic.version = 11 : i64} {
  func.func @_encoder_kernel(%arg0: memref<4x16x32xbf16, #tpu.memory_space<vmem>>, %arg1: memref<9x28x56xbf16, #tpu.memory_space<vmem>>, %arg2: memref<9x40x40xbf16, #tpu.memory_space<vmem>>, %arg3: memref<9x24x24xbf16, #tpu.memory_space<vmem>>, %arg4: memref<3x24x32xf32, #tpu.memory_space<vmem>>, %arg5: memref<6x56xf32, #tpu.memory_space<vmem>>, %arg6: memref<2x32xf32, #tpu.memory_space<vmem>>) attributes {dimension_semantics = [], scalar_prefetch = 0 : i64, scratch_operands = 0 : i64, tpu.core_type = #tpu.core_type<tc>} {
    %c0 = arith.constant 0 : index
    %c0_0 = arith.constant 0 : index
    %0 = vector.load %arg5[%c0, %c0_0] : memref<6x56xf32, #tpu.memory_space<vmem>>, vector<6x56xf32>
    %c0_1 = arith.constant 0 : index
    %c0_2 = arith.constant 0 : index
    %c0_3 = arith.constant 0 : index
    %1 = vector.load %arg0[%c0_1, %c0_2, %c0_3] : memref<4x16x32xbf16, #tpu.memory_space<vmem>>, vector<1x16x32xbf16>
    %2 = vector.shape_cast %1 : vector<1x16x32xbf16> to vector<16x32xbf16>
    %c1 = arith.constant 1 : index
    %c0_4 = arith.constant 0 : index
    %c0_5 = arith.constant 0 : index
    %3 = vector.load %arg0[%c1, %c0_4, %c0_5] : memref<4x16x32xbf16, #tpu.memory_space<vmem>>, vector<1x16x32xbf16>
    %4 = vector.shape_cast %3 : vector<1x16x32xbf16> to vector<16x32xbf16>
    %c2 = arith.constant 2 : index
    %c0_6 = arith.constant 0 : index
    %c0_7 = arith.constant 0 : index
    %5 = vector.load %arg0[%c2, %c0_6, %c0_7] : memref<4x16x32xbf16, #tpu.memory_space<vmem>>, vector<1x16x32xbf16>
    %6 = vector.shape_cast %5 : vector<1x16x32xbf16> to vector<16x32xbf16>
    %c3 = arith.constant 3 : index
    %c0_8 = arith.constant 0 : index
    %c0_9 = arith.constant 0 : index
    %7 = vector.load %arg0[%c3, %c0_8, %c0_9] : memref<4x16x32xbf16, #tpu.memory_space<vmem>>, vector<1x16x32xbf16>
    %8 = vector.shape_cast %7 : vector<1x16x32xbf16> to vector<16x32xbf16>
    %9 = vector.extract_strided_slice %0 {offsets = [0, 0], sizes = [1, 56], strides = [1, 1]} : vector<6x56xf32> to vector<1x56xf32>
    %10 = vector.extract_strided_slice %2 {offsets = [0, 0], sizes = [15, 28], strides = [1, 1]} : vector<16x32xbf16> to vector<15x28xbf16>
    %c0_10 = arith.constant 0 : index
    %c0_11 = arith.constant 0 : index
    %c0_12 = arith.constant 0 : index
    %11 = vector.load %arg1[%c0_10, %c0_11, %c0_12] : memref<9x28x56xbf16, #tpu.memory_space<vmem>>, vector<1x28x56xbf16>
    %12 = vector.shape_cast %11 : vector<1x28x56xbf16> to vector<28x56xbf16>
    %cst = arith.constant dense<0.000000e+00> : vector<15x56xf32>
    %13 = tpu.matmul %10, %12, %cst {dimension_numbers = #tpu.dot_dimension_numbers<[1], [0], [0], [1], [0, 0, 1, 1], [], []>} : vector<15x28xbf16>, vector<28x56xbf16>, vector<15x56xf32> -> vector<15x56xf32>
    %14 = vector.extract_strided_slice %4 {offsets = [0, 0], sizes = [15, 28], strides = [1, 1]} : vector<16x32xbf16> to vector<15x28xbf16>
    %c1_13 = arith.constant 1 : index
    %c0_14 = arith.constant 0 : index
    %c0_15 = arith.constant 0 : index
    %15 = vector.load %arg1[%c1_13, %c0_14, %c0_15] : memref<9x28x56xbf16, #tpu.memory_space<vmem>>, vector<1x28x56xbf16>
    %16 = vector.shape_cast %15 : vector<1x28x56xbf16> to vector<28x56xbf16>
    %cst_16 = arith.constant dense<0.000000e+00> : vector<15x56xf32>
    %17 = tpu.matmul %14, %16, %cst_16 {dimension_numbers = #tpu.dot_dimension_numbers<[1], [0], [0], [1], [0, 0, 1, 1], [], []>} : vector<15x28xbf16>, vector<28x56xbf16>, vector<15x56xf32> -> vector<15x56xf32>
    %18 = arith.addf %13, %17 : vector<15x56xf32>
    %19 = vector.extract_strided_slice %2 {offsets = [0, 4], sizes = [15, 28], strides = [1, 1]} : vector<16x32xbf16> to vector<15x28xbf16>
    %c2_17 = arith.constant 2 : index
    %c0_18 = arith.constant 0 : index
    %c0_19 = arith.constant 0 : index
    %20 = vector.load %arg1[%c2_17, %c0_18, %c0_19] : memref<9x28x56xbf16, #tpu.memory_space<vmem>>, vector<1x28x56xbf16>
    %21 = vector.shape_cast %20 : vector<1x28x56xbf16> to vector<28x56xbf16>
    %cst_20 = arith.constant dense<0.000000e+00> : vector<15x56xf32>
    %22 = tpu.matmul %19, %21, %cst_20 {dimension_numbers = #tpu.dot_dimension_numbers<[1], [0], [0], [1], [0, 0, 1, 1], [], []>} : vector<15x28xbf16>, vector<28x56xbf16>, vector<15x56xf32> -> vector<15x56xf32>
    %23 = arith.addf %18, %22 : vector<15x56xf32>
    %24 = vector.extract_strided_slice %6 {offsets = [0, 0], sizes = [15, 28], strides = [1, 1]} : vector<16x32xbf16> to vector<15x28xbf16>
    %c3_21 = arith.constant 3 : index
    %c0_22 = arith.constant 0 : index
    %c0_23 = arith.constant 0 : index
    %25 = vector.load %arg1[%c3_21, %c0_22, %c0_23] : memref<9x28x56xbf16, #tpu.memory_space<vmem>>, vector<1x28x56xbf16>
    %26 = vector.shape_cast %25 : vector<1x28x56xbf16> to vector<28x56xbf16>
    %cst_24 = arith.constant dense<0.000000e+00> : vector<15x56xf32>
    %27 = tpu.matmul %24, %26, %cst_24 {dimension_numbers = #tpu.dot_dimension_numbers<[1], [0], [0], [1], [0, 0, 1, 1], [], []>} : vector<15x28xbf16>, vector<28x56xbf16>, vector<15x56xf32> -> vector<15x56xf32>
    %28 = arith.addf %23, %27 : vector<15x56xf32>
    %29 = vector.extract_strided_slice %8 {offsets = [0, 0], sizes = [15, 28], strides = [1, 1]} : vector<16x32xbf16> to vector<15x28xbf16>
    %c4 = arith.constant 4 : index
    %c0_25 = arith.constant 0 : index
    %c0_26 = arith.constant 0 : index
    %30 = vector.load %arg1[%c4, %c0_25, %c0_26] : memref<9x28x56xbf16, #tpu.memory_space<vmem>>, vector<1x28x56xbf16>
    %31 = vector.shape_cast %30 : vector<1x28x56xbf16> to vector<28x56xbf16>
    %cst_27 = arith.constant dense<0.000000e+00> : vector<15x56xf32>
    %32 = tpu.matmul %29, %31, %cst_27 {dimension_numbers = #tpu.dot_dimension_numbers<[1], [0], [0], [1], [0, 0, 1, 1], [], []>} : vector<15x28xbf16>, vector<28x56xbf16>, vector<15x56xf32> -> vector<15x56xf32>
    %33 = arith.addf %28, %32 : vector<15x56xf32>
    %34 = vector.extract_strided_slice %6 {offsets = [0, 4], sizes = [15, 28], strides = [1, 1]} : vector<16x32xbf16> to vector<15x28xbf16>
    %c5 = arith.constant 5 : index
    %c0_28 = arith.constant 0 : index
    %c0_29 = arith.constant 0 : index
    %35 = vector.load %arg1[%c5, %c0_28, %c0_29] : memref<9x28x56xbf16, #tpu.memory_space<vmem>>, vector<1x28x56xbf16>
    %36 = vector.shape_cast %35 : vector<1x28x56xbf16> to vector<28x56xbf16>
    %cst_30 = arith.constant dense<0.000000e+00> : vector<15x56xf32>
    %37 = tpu.matmul %34, %36, %cst_30 {dimension_numbers = #tpu.dot_dimension_numbers<[1], [0], [0], [1], [0, 0, 1, 1], [], []>} : vector<15x28xbf16>, vector<28x56xbf16>, vector<15x56xf32> -> vector<15x56xf32>
    %38 = arith.addf %33, %37 : vector<15x56xf32>
    %39 = vector.extract_strided_slice %2 {offsets = [1, 0], sizes = [15, 28], strides = [1, 1]} : vector<16x32xbf16> to vector<15x28xbf16>
    %c6 = arith.constant 6 : index
    %c0_31 = arith.constant 0 : index
    %c0_32 = arith.constant 0 : index
    %40 = vector.load %arg1[%c6, %c0_31, %c0_32] : memref<9x28x56xbf16, #tpu.memory_space<vmem>>, vector<1x28x56xbf16>
    %41 = vector.shape_cast %40 : vector<1x28x56xbf16> to vector<28x56xbf16>
    %cst_33 = arith.constant dense<0.000000e+00> : vector<15x56xf32>
    %42 = tpu.matmul %39, %41, %cst_33 {dimension_numbers = #tpu.dot_dimension_numbers<[1], [0], [0], [1], [0, 0, 1, 1], [], []>} : vector<15x28xbf16>, vector<28x56xbf16>, vector<15x56xf32> -> vector<15x56xf32>
    %43 = arith.addf %38, %42 : vector<15x56xf32>
    %44 = vector.extract_strided_slice %4 {offsets = [1, 0], sizes = [15, 28], strides = [1, 1]} : vector<16x32xbf16> to vector<15x28xbf16>
    %c7 = arith.constant 7 : index
    %c0_34 = arith.constant 0 : index
    %c0_35 = arith.constant 0 : index
    %45 = vector.load %arg1[%c7, %c0_34, %c0_35] : memref<9x28x56xbf16, #tpu.memory_space<vmem>>, vector<1x28x56xbf16>
    %46 = vector.shape_cast %45 : vector<1x28x56xbf16> to vector<28x56xbf16>
    %cst_36 = arith.constant dense<0.000000e+00> : vector<15x56xf32>
    %47 = tpu.matmul %44, %46, %cst_36 {dimension_numbers = #tpu.dot_dimension_numbers<[1], [0], [0], [1], [0, 0, 1, 1], [], []>} : vector<15x28xbf16>, vector<28x56xbf16>, vector<15x56xf32> -> vector<15x56xf32>
    %48 = arith.addf %43, %47 : vector<15x56xf32>
    %49 = vector.extract_strided_slice %2 {offsets = [1, 4], sizes = [15, 28], strides = [1, 1]} : vector<16x32xbf16> to vector<15x28xbf16>
    %c8 = arith.constant 8 : index
    %c0_37 = arith.constant 0 : index
    %c0_38 = arith.constant 0 : index
    %50 = vector.load %arg1[%c8, %c0_37, %c0_38] : memref<9x28x56xbf16, #tpu.memory_space<vmem>>, vector<1x28x56xbf16>
    %51 = vector.shape_cast %50 : vector<1x28x56xbf16> to vector<28x56xbf16>
    %cst_39 = arith.constant dense<0.000000e+00> : vector<15x56xf32>
    %52 = tpu.matmul %49, %51, %cst_39 {dimension_numbers = #tpu.dot_dimension_numbers<[1], [0], [0], [1], [0, 0, 1, 1], [], []>} : vector<15x28xbf16>, vector<28x56xbf16>, vector<15x56xf32> -> vector<15x56xf32>
    %53 = arith.addf %48, %52 : vector<15x56xf32>
    %54 = vector.broadcast %9 : vector<1x56xf32> to vector<15x56xf32>
    %55 = arith.addf %53, %54 : vector<15x56xf32>
    %cst_40 = arith.constant 0.000000e+00 : f32
    %56 = vector.broadcast %cst_40 : f32 to vector<15x56xf32>
    %57 = arith.maximumf %55, %56 : vector<15x56xf32>
    %58 = arith.truncf %57 : vector<15x56xf32> to vector<15x56xbf16>
    %59 = vector.extract_strided_slice %0 {offsets = [1, 0], sizes = [1, 40], strides = [1, 1]} : vector<6x56xf32> to vector<1x40xf32>
    %60 = vector.extract_strided_slice %58 {offsets = [0, 0], sizes = [13, 40], strides = [1, 1]} : vector<15x56xbf16> to vector<13x40xbf16>
    %c0_41 = arith.constant 0 : index
    %c0_42 = arith.constant 0 : index
    %c0_43 = arith.constant 0 : index
    %61 = vector.load %arg2[%c0_41, %c0_42, %c0_43] : memref<9x40x40xbf16, #tpu.memory_space<vmem>>, vector<1x40x40xbf16>
    %62 = vector.shape_cast %61 : vector<1x40x40xbf16> to vector<40x40xbf16>
    %cst_44 = arith.constant dense<0.000000e+00> : vector<13x40xf32>
    %63 = tpu.matmul %60, %62, %cst_44 {dimension_numbers = #tpu.dot_dimension_numbers<[1], [0], [0], [1], [0, 0, 1, 1], [], []>} : vector<13x40xbf16>, vector<40x40xbf16>, vector<13x40xf32> -> vector<13x40xf32>
    %64 = vector.extract_strided_slice %58 {offsets = [0, 8], sizes = [13, 40], strides = [1, 1]} : vector<15x56xbf16> to vector<13x40xbf16>
    %c1_45 = arith.constant 1 : index
    %c0_46 = arith.constant 0 : index
    %c0_47 = arith.constant 0 : index
    %65 = vector.load %arg2[%c1_45, %c0_46, %c0_47] : memref<9x40x40xbf16, #tpu.memory_space<vmem>>, vector<1x40x40xbf16>
    %66 = vector.shape_cast %65 : vector<1x40x40xbf16> to vector<40x40xbf16>
    %cst_48 = arith.constant dense<0.000000e+00> : vector<13x40xf32>
    %67 = tpu.matmul %64, %66, %cst_48 {dimension_numbers = #tpu.dot_dimension_numbers<[1], [0], [0], [1], [0, 0, 1, 1], [], []>} : vector<13x40xbf16>, vector<40x40xbf16>, vector<13x40xf32> -> vector<13x40xf32>
    %68 = arith.addf %63, %67 : vector<13x40xf32>
    %69 = vector.extract_strided_slice %58 {offsets = [0, 16], sizes = [13, 40], strides = [1, 1]} : vector<15x56xbf16> to vector<13x40xbf16>
    %c2_49 = arith.constant 2 : index
    %c0_50 = arith.constant 0 : index
    %c0_51 = arith.constant 0 : index
    %70 = vector.load %arg2[%c2_49, %c0_50, %c0_51] : memref<9x40x40xbf16, #tpu.memory_space<vmem>>, vector<1x40x40xbf16>
    %71 = vector.shape_cast %70 : vector<1x40x40xbf16> to vector<40x40xbf16>
    %cst_52 = arith.constant dense<0.000000e+00> : vector<13x40xf32>
    %72 = tpu.matmul %69, %71, %cst_52 {dimension_numbers = #tpu.dot_dimension_numbers<[1], [0], [0], [1], [0, 0, 1, 1], [], []>} : vector<13x40xbf16>, vector<40x40xbf16>, vector<13x40xf32> -> vector<13x40xf32>
    %73 = arith.addf %68, %72 : vector<13x40xf32>
    %74 = vector.extract_strided_slice %58 {offsets = [1, 0], sizes = [13, 40], strides = [1, 1]} : vector<15x56xbf16> to vector<13x40xbf16>
    %c3_53 = arith.constant 3 : index
    %c0_54 = arith.constant 0 : index
    %c0_55 = arith.constant 0 : index
    %75 = vector.load %arg2[%c3_53, %c0_54, %c0_55] : memref<9x40x40xbf16, #tpu.memory_space<vmem>>, vector<1x40x40xbf16>
    %76 = vector.shape_cast %75 : vector<1x40x40xbf16> to vector<40x40xbf16>
    %cst_56 = arith.constant dense<0.000000e+00> : vector<13x40xf32>
    %77 = tpu.matmul %74, %76, %cst_56 {dimension_numbers = #tpu.dot_dimension_numbers<[1], [0], [0], [1], [0, 0, 1, 1], [], []>} : vector<13x40xbf16>, vector<40x40xbf16>, vector<13x40xf32> -> vector<13x40xf32>
    %78 = arith.addf %73, %77 : vector<13x40xf32>
    %79 = vector.extract_strided_slice %58 {offsets = [1, 8], sizes = [13, 40], strides = [1, 1]} : vector<15x56xbf16> to vector<13x40xbf16>
    %c4_57 = arith.constant 4 : index
    %c0_58 = arith.constant 0 : index
    %c0_59 = arith.constant 0 : index
    %80 = vector.load %arg2[%c4_57, %c0_58, %c0_59] : memref<9x40x40xbf16, #tpu.memory_space<vmem>>, vector<1x40x40xbf16>
    %81 = vector.shape_cast %80 : vector<1x40x40xbf16> to vector<40x40xbf16>
    %cst_60 = arith.constant dense<0.000000e+00> : vector<13x40xf32>
    %82 = tpu.matmul %79, %81, %cst_60 {dimension_numbers = #tpu.dot_dimension_numbers<[1], [0], [0], [1], [0, 0, 1, 1], [], []>} : vector<13x40xbf16>, vector<40x40xbf16>, vector<13x40xf32> -> vector<13x40xf32>
    %83 = arith.addf %78, %82 : vector<13x40xf32>
    %84 = vector.extract_strided_slice %58 {offsets = [1, 16], sizes = [13, 40], strides = [1, 1]} : vector<15x56xbf16> to vector<13x40xbf16>
    %c5_61 = arith.constant 5 : index
    %c0_62 = arith.constant 0 : index
    %c0_63 = arith.constant 0 : index
    %85 = vector.load %arg2[%c5_61, %c0_62, %c0_63] : memref<9x40x40xbf16, #tpu.memory_space<vmem>>, vector<1x40x40xbf16>
    %86 = vector.shape_cast %85 : vector<1x40x40xbf16> to vector<40x40xbf16>
    %cst_64 = arith.constant dense<0.000000e+00> : vector<13x40xf32>
    %87 = tpu.matmul %84, %86, %cst_64 {dimension_numbers = #tpu.dot_dimension_numbers<[1], [0], [0], [1], [0, 0, 1, 1], [], []>} : vector<13x40xbf16>, vector<40x40xbf16>, vector<13x40xf32> -> vector<13x40xf32>
    %88 = arith.addf %83, %87 : vector<13x40xf32>
    %89 = vector.extract_strided_slice %58 {offsets = [2, 0], sizes = [13, 40], strides = [1, 1]} : vector<15x56xbf16> to vector<13x40xbf16>
    %c6_65 = arith.constant 6 : index
    %c0_66 = arith.constant 0 : index
    %c0_67 = arith.constant 0 : index
    %90 = vector.load %arg2[%c6_65, %c0_66, %c0_67] : memref<9x40x40xbf16, #tpu.memory_space<vmem>>, vector<1x40x40xbf16>
    %91 = vector.shape_cast %90 : vector<1x40x40xbf16> to vector<40x40xbf16>
    %cst_68 = arith.constant dense<0.000000e+00> : vector<13x40xf32>
    %92 = tpu.matmul %89, %91, %cst_68 {dimension_numbers = #tpu.dot_dimension_numbers<[1], [0], [0], [1], [0, 0, 1, 1], [], []>} : vector<13x40xbf16>, vector<40x40xbf16>, vector<13x40xf32> -> vector<13x40xf32>
    %93 = arith.addf %88, %92 : vector<13x40xf32>
    %94 = vector.extract_strided_slice %58 {offsets = [2, 8], sizes = [13, 40], strides = [1, 1]} : vector<15x56xbf16> to vector<13x40xbf16>
    %c7_69 = arith.constant 7 : index
    %c0_70 = arith.constant 0 : index
    %c0_71 = arith.constant 0 : index
    %95 = vector.load %arg2[%c7_69, %c0_70, %c0_71] : memref<9x40x40xbf16, #tpu.memory_space<vmem>>, vector<1x40x40xbf16>
    %96 = vector.shape_cast %95 : vector<1x40x40xbf16> to vector<40x40xbf16>
    %cst_72 = arith.constant dense<0.000000e+00> : vector<13x40xf32>
    %97 = tpu.matmul %94, %96, %cst_72 {dimension_numbers = #tpu.dot_dimension_numbers<[1], [0], [0], [1], [0, 0, 1, 1], [], []>} : vector<13x40xbf16>, vector<40x40xbf16>, vector<13x40xf32> -> vector<13x40xf32>
    %98 = arith.addf %93, %97 : vector<13x40xf32>
    %99 = vector.extract_strided_slice %58 {offsets = [2, 16], sizes = [13, 40], strides = [1, 1]} : vector<15x56xbf16> to vector<13x40xbf16>
    %c8_73 = arith.constant 8 : index
    %c0_74 = arith.constant 0 : index
    %c0_75 = arith.constant 0 : index
    %100 = vector.load %arg2[%c8_73, %c0_74, %c0_75] : memref<9x40x40xbf16, #tpu.memory_space<vmem>>, vector<1x40x40xbf16>
    %101 = vector.shape_cast %100 : vector<1x40x40xbf16> to vector<40x40xbf16>
    %cst_76 = arith.constant dense<0.000000e+00> : vector<13x40xf32>
    %102 = tpu.matmul %99, %101, %cst_76 {dimension_numbers = #tpu.dot_dimension_numbers<[1], [0], [0], [1], [0, 0, 1, 1], [], []>} : vector<13x40xbf16>, vector<40x40xbf16>, vector<13x40xf32> -> vector<13x40xf32>
    %103 = arith.addf %98, %102 : vector<13x40xf32>
    %104 = vector.broadcast %59 : vector<1x40xf32> to vector<13x40xf32>
    %105 = arith.addf %103, %104 : vector<13x40xf32>
    %cst_77 = arith.constant 0.000000e+00 : f32
    %106 = vector.broadcast %cst_77 : f32 to vector<13x40xf32>
    %107 = arith.maximumf %105, %106 : vector<13x40xf32>
    %108 = arith.truncf %107 : vector<13x40xf32> to vector<13x40xbf16>
    %109 = vector.extract_strided_slice %0 {offsets = [2, 0], sizes = [1, 24], strides = [1, 1]} : vector<6x56xf32> to vector<1x24xf32>
    %110 = vector.extract_strided_slice %108 {offsets = [0, 0], sizes = [11, 24], strides = [1, 1]} : vector<13x40xbf16> to vector<11x24xbf16>
    %c0_78 = arith.constant 0 : index
    %c0_79 = arith.constant 0 : index
    %c0_80 = arith.constant 0 : index
    %111 = vector.load %arg3[%c0_78, %c0_79, %c0_80] : memref<9x24x24xbf16, #tpu.memory_space<vmem>>, vector<1x24x24xbf16>
    %112 = vector.shape_cast %111 : vector<1x24x24xbf16> to vector<24x24xbf16>
    %cst_81 = arith.constant dense<0.000000e+00> : vector<11x24xf32>
    %113 = tpu.matmul %110, %112, %cst_81 {dimension_numbers = #tpu.dot_dimension_numbers<[1], [0], [0], [1], [0, 0, 1, 1], [], []>} : vector<11x24xbf16>, vector<24x24xbf16>, vector<11x24xf32> -> vector<11x24xf32>
    %114 = vector.extract_strided_slice %108 {offsets = [0, 8], sizes = [11, 24], strides = [1, 1]} : vector<13x40xbf16> to vector<11x24xbf16>
    %c1_82 = arith.constant 1 : index
    %c0_83 = arith.constant 0 : index
    %c0_84 = arith.constant 0 : index
    %115 = vector.load %arg3[%c1_82, %c0_83, %c0_84] : memref<9x24x24xbf16, #tpu.memory_space<vmem>>, vector<1x24x24xbf16>
    %116 = vector.shape_cast %115 : vector<1x24x24xbf16> to vector<24x24xbf16>
    %cst_85 = arith.constant dense<0.000000e+00> : vector<11x24xf32>
    %117 = tpu.matmul %114, %116, %cst_85 {dimension_numbers = #tpu.dot_dimension_numbers<[1], [0], [0], [1], [0, 0, 1, 1], [], []>} : vector<11x24xbf16>, vector<24x24xbf16>, vector<11x24xf32> -> vector<11x24xf32>
    %118 = arith.addf %113, %117 : vector<11x24xf32>
    %119 = vector.extract_strided_slice %108 {offsets = [0, 16], sizes = [11, 24], strides = [1, 1]} : vector<13x40xbf16> to vector<11x24xbf16>
    %c2_86 = arith.constant 2 : index
    %c0_87 = arith.constant 0 : index
    %c0_88 = arith.constant 0 : index
    %120 = vector.load %arg3[%c2_86, %c0_87, %c0_88] : memref<9x24x24xbf16, #tpu.memory_space<vmem>>, vector<1x24x24xbf16>
    %121 = vector.shape_cast %120 : vector<1x24x24xbf16> to vector<24x24xbf16>
    %cst_89 = arith.constant dense<0.000000e+00> : vector<11x24xf32>
    %122 = tpu.matmul %119, %121, %cst_89 {dimension_numbers = #tpu.dot_dimension_numbers<[1], [0], [0], [1], [0, 0, 1, 1], [], []>} : vector<11x24xbf16>, vector<24x24xbf16>, vector<11x24xf32> -> vector<11x24xf32>
    %123 = arith.addf %118, %122 : vector<11x24xf32>
    %124 = vector.extract_strided_slice %108 {offsets = [1, 0], sizes = [11, 24], strides = [1, 1]} : vector<13x40xbf16> to vector<11x24xbf16>
    %c3_90 = arith.constant 3 : index
    %c0_91 = arith.constant 0 : index
    %c0_92 = arith.constant 0 : index
    %125 = vector.load %arg3[%c3_90, %c0_91, %c0_92] : memref<9x24x24xbf16, #tpu.memory_space<vmem>>, vector<1x24x24xbf16>
    %126 = vector.shape_cast %125 : vector<1x24x24xbf16> to vector<24x24xbf16>
    %cst_93 = arith.constant dense<0.000000e+00> : vector<11x24xf32>
    %127 = tpu.matmul %124, %126, %cst_93 {dimension_numbers = #tpu.dot_dimension_numbers<[1], [0], [0], [1], [0, 0, 1, 1], [], []>} : vector<11x24xbf16>, vector<24x24xbf16>, vector<11x24xf32> -> vector<11x24xf32>
    %128 = arith.addf %123, %127 : vector<11x24xf32>
    %129 = vector.extract_strided_slice %108 {offsets = [1, 8], sizes = [11, 24], strides = [1, 1]} : vector<13x40xbf16> to vector<11x24xbf16>
    %c4_94 = arith.constant 4 : index
    %c0_95 = arith.constant 0 : index
    %c0_96 = arith.constant 0 : index
    %130 = vector.load %arg3[%c4_94, %c0_95, %c0_96] : memref<9x24x24xbf16, #tpu.memory_space<vmem>>, vector<1x24x24xbf16>
    %131 = vector.shape_cast %130 : vector<1x24x24xbf16> to vector<24x24xbf16>
    %cst_97 = arith.constant dense<0.000000e+00> : vector<11x24xf32>
    %132 = tpu.matmul %129, %131, %cst_97 {dimension_numbers = #tpu.dot_dimension_numbers<[1], [0], [0], [1], [0, 0, 1, 1], [], []>} : vector<11x24xbf16>, vector<24x24xbf16>, vector<11x24xf32> -> vector<11x24xf32>
    %133 = arith.addf %128, %132 : vector<11x24xf32>
    %134 = vector.extract_strided_slice %108 {offsets = [1, 16], sizes = [11, 24], strides = [1, 1]} : vector<13x40xbf16> to vector<11x24xbf16>
    %c5_98 = arith.constant 5 : index
    %c0_99 = arith.constant 0 : index
    %c0_100 = arith.constant 0 : index
    %135 = vector.load %arg3[%c5_98, %c0_99, %c0_100] : memref<9x24x24xbf16, #tpu.memory_space<vmem>>, vector<1x24x24xbf16>
    %136 = vector.shape_cast %135 : vector<1x24x24xbf16> to vector<24x24xbf16>
    %cst_101 = arith.constant dense<0.000000e+00> : vector<11x24xf32>
    %137 = tpu.matmul %134, %136, %cst_101 {dimension_numbers = #tpu.dot_dimension_numbers<[1], [0], [0], [1], [0, 0, 1, 1], [], []>} : vector<11x24xbf16>, vector<24x24xbf16>, vector<11x24xf32> -> vector<11x24xf32>
    %138 = arith.addf %133, %137 : vector<11x24xf32>
    %139 = vector.extract_strided_slice %108 {offsets = [2, 0], sizes = [11, 24], strides = [1, 1]} : vector<13x40xbf16> to vector<11x24xbf16>
    %c6_102 = arith.constant 6 : index
    %c0_103 = arith.constant 0 : index
    %c0_104 = arith.constant 0 : index
    %140 = vector.load %arg3[%c6_102, %c0_103, %c0_104] : memref<9x24x24xbf16, #tpu.memory_space<vmem>>, vector<1x24x24xbf16>
    %141 = vector.shape_cast %140 : vector<1x24x24xbf16> to vector<24x24xbf16>
    %cst_105 = arith.constant dense<0.000000e+00> : vector<11x24xf32>
    %142 = tpu.matmul %139, %141, %cst_105 {dimension_numbers = #tpu.dot_dimension_numbers<[1], [0], [0], [1], [0, 0, 1, 1], [], []>} : vector<11x24xbf16>, vector<24x24xbf16>, vector<11x24xf32> -> vector<11x24xf32>
    %143 = arith.addf %138, %142 : vector<11x24xf32>
    %144 = vector.extract_strided_slice %108 {offsets = [2, 8], sizes = [11, 24], strides = [1, 1]} : vector<13x40xbf16> to vector<11x24xbf16>
    %c7_106 = arith.constant 7 : index
    %c0_107 = arith.constant 0 : index
    %c0_108 = arith.constant 0 : index
    %145 = vector.load %arg3[%c7_106, %c0_107, %c0_108] : memref<9x24x24xbf16, #tpu.memory_space<vmem>>, vector<1x24x24xbf16>
    %146 = vector.shape_cast %145 : vector<1x24x24xbf16> to vector<24x24xbf16>
    %cst_109 = arith.constant dense<0.000000e+00> : vector<11x24xf32>
    %147 = tpu.matmul %144, %146, %cst_109 {dimension_numbers = #tpu.dot_dimension_numbers<[1], [0], [0], [1], [0, 0, 1, 1], [], []>} : vector<11x24xbf16>, vector<24x24xbf16>, vector<11x24xf32> -> vector<11x24xf32>
    %148 = arith.addf %143, %147 : vector<11x24xf32>
    %149 = vector.extract_strided_slice %108 {offsets = [2, 16], sizes = [11, 24], strides = [1, 1]} : vector<13x40xbf16> to vector<11x24xbf16>
    %c8_110 = arith.constant 8 : index
    %c0_111 = arith.constant 0 : index
    %c0_112 = arith.constant 0 : index
    %150 = vector.load %arg3[%c8_110, %c0_111, %c0_112] : memref<9x24x24xbf16, #tpu.memory_space<vmem>>, vector<1x24x24xbf16>
    %151 = vector.shape_cast %150 : vector<1x24x24xbf16> to vector<24x24xbf16>
    %cst_113 = arith.constant dense<0.000000e+00> : vector<11x24xf32>
    %152 = tpu.matmul %149, %151, %cst_113 {dimension_numbers = #tpu.dot_dimension_numbers<[1], [0], [0], [1], [0, 0, 1, 1], [], []>} : vector<11x24xbf16>, vector<24x24xbf16>, vector<11x24xf32> -> vector<11x24xf32>
    %153 = arith.addf %148, %152 : vector<11x24xf32>
    %154 = vector.broadcast %109 : vector<1x24xf32> to vector<11x24xf32>
    %155 = arith.addf %153, %154 : vector<11x24xf32>
    %cst_114 = arith.constant 0.000000e+00 : f32
    %156 = vector.broadcast %cst_114 : f32 to vector<11x24xf32>
    %157 = arith.maximumf %155, %156 : vector<11x24xf32>
    %c0_115 = arith.constant 0 : index
    %c0_116 = arith.constant 0 : index
    %c0_117 = arith.constant 0 : index
    %158 = vector.load %arg4[%c0_115, %c0_116, %c0_117] : memref<3x24x32xf32, #tpu.memory_space<vmem>>, vector<1x24x32xf32>
    %159 = vector.shape_cast %158 : vector<1x24x32xf32> to vector<24x32xf32>
    %cst_118 = arith.constant dense<0.000000e+00> : vector<11x32xf32>
    %160 = tpu.matmul %157, %159, %cst_118 {dimension_numbers = #tpu.dot_dimension_numbers<[1], [0], [0], [1], [0, 0, 1, 1], [], []>} : vector<11x24xf32>, vector<24x32xf32>, vector<11x32xf32> -> vector<11x32xf32>
    %c1_119 = arith.constant 1 : index
    %c0_120 = arith.constant 0 : index
    %c0_121 = arith.constant 0 : index
    %161 = vector.load %arg4[%c1_119, %c0_120, %c0_121] : memref<3x24x32xf32, #tpu.memory_space<vmem>>, vector<1x24x32xf32>
    %162 = vector.shape_cast %161 : vector<1x24x32xf32> to vector<24x32xf32>
    %cst_122 = arith.constant dense<0.000000e+00> : vector<11x32xf32>
    %163 = tpu.matmul %157, %162, %cst_122 {dimension_numbers = #tpu.dot_dimension_numbers<[1], [0], [0], [1], [0, 0, 1, 1], [], []>} : vector<11x24xf32>, vector<24x32xf32>, vector<11x32xf32> -> vector<11x32xf32>
    %c2_123 = arith.constant 2 : index
    %c0_124 = arith.constant 0 : index
    %c0_125 = arith.constant 0 : index
    %164 = vector.load %arg4[%c2_123, %c0_124, %c0_125] : memref<3x24x32xf32, #tpu.memory_space<vmem>>, vector<1x24x32xf32>
    %165 = vector.shape_cast %164 : vector<1x24x32xf32> to vector<24x32xf32>
    %cst_126 = arith.constant dense<0.000000e+00> : vector<11x32xf32>
    %166 = tpu.matmul %157, %165, %cst_126 {dimension_numbers = #tpu.dot_dimension_numbers<[1], [0], [0], [1], [0, 0, 1, 1], [], []>} : vector<11x24xf32>, vector<24x32xf32>, vector<11x32xf32> -> vector<11x32xf32>
    %167 = vector.extract_strided_slice %160 {offsets = [0, 0], sizes = [9, 32], strides = [1, 1]} : vector<11x32xf32> to vector<9x32xf32>
    %168 = vector.extract_strided_slice %163 {offsets = [1, 0], sizes = [9, 32], strides = [1, 1]} : vector<11x32xf32> to vector<9x32xf32>
    %169 = arith.addf %167, %168 : vector<9x32xf32>
    %170 = vector.extract_strided_slice %166 {offsets = [2, 0], sizes = [9, 32], strides = [1, 1]} : vector<11x32xf32> to vector<9x32xf32>
    %171 = arith.addf %169, %170 : vector<9x32xf32>
    %172 = vector.extract_strided_slice %171 {offsets = [0, 0], sizes = [1, 32], strides = [1, 1]} : vector<9x32xf32> to vector<1x32xf32>
    %173 = vector.extract_strided_slice %171 {offsets = [8, 0], sizes = [1, 32], strides = [1, 1]} : vector<9x32xf32> to vector<1x32xf32>
    %174 = tpu.concatenate %172, %173 in 0 : vector<1x32xf32>, vector<1x32xf32> -> vector<2x32xf32>
    %175 = vector.extract_strided_slice %0 {offsets = [3, 0], sizes = [1, 32], strides = [1, 1]} : vector<6x56xf32> to vector<1x32xf32>
    %176 = vector.broadcast %175 : vector<1x32xf32> to vector<2x32xf32>
    %177 = arith.addf %174, %176 : vector<2x32xf32>
    %cst_127 = arith.constant dense<0.000000e+00> : vector<2xf32>
    %178 = vector.multi_reduction <add>, %177, %cst_127 [1] : vector<2x32xf32> to vector<2xf32>
    %179 = vector.shape_cast %178 : vector<2xf32> to vector<2x1xf32>
    %cst_128 = arith.constant 3.125000e-02 : f32
    %180 = vector.broadcast %cst_128 : f32 to vector<2x1xf32>
    %181 = arith.mulf %179, %180 : vector<2x1xf32>
    %182 = vector.broadcast %181 : vector<2x1xf32> to vector<2x32xf32>
    %183 = arith.subf %177, %182 : vector<2x32xf32>
    %184 = arith.mulf %183, %183 : vector<2x32xf32>
    %cst_129 = arith.constant dense<0.000000e+00> : vector<2xf32>
    %185 = vector.multi_reduction <add>, %184, %cst_129 [1] : vector<2x32xf32> to vector<2xf32>
    %186 = vector.shape_cast %185 : vector<2xf32> to vector<2x1xf32>
    %cst_130 = arith.constant 3.125000e-02 : f32
    %187 = vector.broadcast %cst_130 : f32 to vector<2x1xf32>
    %188 = arith.mulf %186, %187 : vector<2x1xf32>
    %cst_131 = arith.constant 9.99999974E-6 : f32
    %189 = vector.broadcast %cst_131 : f32 to vector<2x1xf32>
    %190 = arith.addf %188, %189 : vector<2x1xf32>
    %191 = math.rsqrt %190 : vector<2x1xf32>
    %192 = vector.broadcast %191 : vector<2x1xf32> to vector<2x32xf32>
    %193 = arith.mulf %183, %192 : vector<2x32xf32>
    %194 = vector.extract_strided_slice %0 {offsets = [4, 0], sizes = [1, 32], strides = [1, 1]} : vector<6x56xf32> to vector<1x32xf32>
    %195 = vector.broadcast %194 : vector<1x32xf32> to vector<2x32xf32>
    %196 = arith.mulf %193, %195 : vector<2x32xf32>
    %197 = vector.extract_strided_slice %0 {offsets = [5, 0], sizes = [1, 32], strides = [1, 1]} : vector<6x56xf32> to vector<1x32xf32>
    %198 = vector.broadcast %197 : vector<1x32xf32> to vector<2x32xf32>
    %199 = arith.addf %196, %198 : vector<2x32xf32>
    %200 = math.tanh %199 : vector<2x32xf32>
    %c0_132 = arith.constant 0 : index
    %c0_133 = arith.constant 0 : index
    %201 = vector.load %arg6[%c0_132, %c0_133] : memref<2x32xf32, #tpu.memory_space<vmem>>, vector<2x32xf32>
    tpu.vector_store %arg6[%c0_132, %c0_133], %200 {strides = array<i32>} : memref<2x32xf32, #tpu.memory_space<vmem>>, vector<2x32xf32>,
    return
  }
}

</mosaic_0001>

<bundles_post_ra>
// kernel: encoder_forward.1
= control target key start
LH: loop header
LB: loop body
LE: loop exit
PB: predicated region body
PF: predicated region fallthrough
CT: control target
= control target key end

     0   :  { %s2902_s25 = smov 124   ;;  %v2903_v4 = vmov 0.0   ;;  %vm66_vm0 = vcmask 1045504   ;;  %vm2904_vm1 = vmmov 0   ;;  %vm62_vm2 = vcmask 228352   ;;  %s3409_s0 = inlined_call_operand.vmem [shape: bf16[4,16,32], index: 0, kind: input, shape index: {}]   ;;  %s3410_s1 = inlined_call_operand.vmem [shape: bf16[9,28,56], index: 1, kind: input, shape index: {}]   ;;  %s3411_s2 = inlined_call_operand.vmem [shape: bf16[9,40,40], index: 2, kind: input, shape index: {}]   ;;  %s3412_s3 = inlined_call_operand.vmem [shape: bf16[9,24,24], index: 3, kind: input, shape index: {}]   ;;  %s3413_s4 = inlined_call_operand.vmem [shape: f32[3,24,32], index: 4, kind: input, shape index: {}]   ;;  %s3414_s5 = inlined_call_operand.vmem [shape: f32[6,56], index: 5, kind: input, shape index: {}]   ;;  %s3415_s6 = inlined_call_operand.hbm [shape: f32[2,32], index: 6, kind: output, shape index: {}]  }
   0x1   :  { %v2807_v0 = vld [vmem:[%s3409_s0] sm:$0xff]   ;;  %v2808_v1 = vld [vmem:[%s3409_s0 + $0x10] sm:$0xff]   ;;  %2528 = vmatprep.subr.bf16.mxu0 %v2903_v4  ;;  %2536 = vmatprep.subr.bf16.mxu1 %v2903_v4  ;;  %v2811_v8 = vld [vmem:[%s3410_s1 + $0x18] sm:$0x3f]  }
   0x2   :  { %179 = vrot.lane.b32.xlu0 %v2807_v0, %s2902_s25  ;;  %v453_v2 = vshrl.u32 %v2807_v0, 16  ;;  %v455_v3 = vshll.u32 %v2807_v0, 16  ;;  %v2809_v5 = vld [vmem:[%s3410_s1 + $0x10] sm:$0xff]   ;;  %v2810_v7 = vld [vmem:[%s3410_s1] sm:$0xff]   ;;  %v2812_v10 = vld [vmem:[%s3410_s1 + $0x8] sm:$0x3f]   ;;  %2532 = vmatprep.mubr.msk.bf16.mxu0 %vm2904_vm1, %v2903_v4 }
   0x3   :  { %2529 = vmatpush3.bf16.msra.mxu0 %v2809_v5  ;;  %2537 = vmatpush3.bf16.msra.mxu1 %v2810_v7  ;;  %v68_v11 = vsel %vm66_vm0, %v2811_v8, 0  ;;  %v131_v12 = vsel %vm66_vm0, %v2812_v10, 0  ;;  %v2975_v13 = vld [vmem:[%s3409_s0 + $0x8] sm:$0xff]   ;;  %v2814_v14 = vld [vmem:[%s3410_s1 + $0x20] sm:$0xff]   ;;  %v2815_v15 = vld [vmem:[%s3410_s1 + $0x30] sm:$0xff]  }
   0x4   :  { %v457_v6 = vrot.slane %v455_v3, 1  ;;  %2530 = vmatprep.subr.bf16.mxu0 %v2903_v4  ;;  %2538 = vmatprep.subr.bf16.mxu1 %v2903_v4  ;;  %v2816_v16 = vld [vmem:[%s3410_s1 + $0x28] sm:$0x3f]   ;;  %v2817_v17 = vld [vmem:[%s3410_s1 + $0x38] sm:$0x3f]   ;;  %v2819_v20 = vld [vmem:[%s3410_s1 + $0x50] sm:$0xff]  }
   0x5   :  { %2540 = vmatprep.mubr.msk.bf16.mxu1 %vm2904_vm1, %v2903_v4  ;;  %v196_v18 = vsel %vm66_vm0, %v2816_v16, 0  ;;  %v266_v19 = vsel %vm66_vm0, %v2817_v17, 0  ;;  %v2821_v21 = vld [vmem:[%s3410_s1 + $0x58] sm:$0x3f]  }
   0x6   :  { %386 = vrot.lane.b32.xlu0 %v2808_v1, %s2902_s25  ;;  %v2960_v9 = vor.u32 %v457_v6, %v453_v2  ;;  %v403_v22 = vsel %vm66_vm0, %v2821_v21, 0 }
   0x7   :  { %2531 = vmatpush3.bf16.msra.mxu0 %v68_v11  ;;  %2539 = vmatpush3.bf16.msra.mxu1 %v131_v12 }
   0x8   :  { %595 = vrot.lane.b32.xlu1 %v2960_v9, %s2902_s25  ;;  %2544 = vmatprep.subr.bf16.mxu0 %v2903_v4 }
   0x9   :  { %2552 = vmatprep.subr.bf16.mxu1 %v2903_v4 }
   0xa   :  { %2533 = vmatmul.mubr.msk.bf16.vlgmr.msra.gmra.mrb[0].mxu0 %vm62_vm2, %v2975_v13  ;;  %2541 = vmatmul.mubr.msk.bf16.vlgmr.msra.gmra.mrb[0].mxu1 %vm62_vm2, %v2807_v0 }
   0xb   :  { %2545 = vmatpush3.bf16.msra.mxu0 %v2814_v14  ;;  %2553 = vmatpush3.bf16.msra.mxu1 %v2815_v15 }
   0xc   :  { %2546 = vmatprep.subr.bf16.mxu0 %v2903_v4  ;;  %2554 = vmatprep.subr.bf16.mxu1 %v2903_v4 }
   0xd   :  { %2548 = vmatprep.mubr.msk.bf16.mxu0 %vm2904_vm1, %v2903_v4  ;;  %2556 = vmatprep.mubr.msk.bf16.mxu1 %vm2904_vm1, %v2903_v4 }
   0xf   :  { %2547 = vmatpush3.bf16.msra.mxu0 %v196_v18  ;;  %2555 = vmatpush3.bf16.msra.mxu1 %v266_v19 }
  0x10   :  { %2560 = vmatprep.subr.bf16.mxu0 %v2903_v4  ;;  %2568 = vmatprep.subr.bf16.mxu1 %v2903_v4 }
  0x12   :  { %2557 = vmatmul.mubr.msk.bf16.vlgmr.msra.gmra.mrb[4].mxu1 %vm62_vm2, %v2808_v1 }
  0x13   :  { %2569 = vmatpush3.bf16.msra.mxu1 %v2819_v20  ;;  %2572 = vmatprep.mubr.msk.bf16.mxu1 %vm2904_vm1, %v2903_v4 }
  0x14   :  { %2570 = vmatprep.subr.bf16.mxu1 %v2903_v4 }
  0x17   :  { %2571 = vmatpush3.bf16.msra.mxu1 %v403_v22 }
  0x18   :  { %2584 = vmatprep.subr.bf16.mxu1 %v2903_v4 }
  0x19   :  { %11 = vsyncpa [#allocation3], 0  ;;  %v2818_v23 = vld [vmem:[%s3410_s1 + $0x40] sm:$0xff]   ;;  %v2820_v24 = vld [vmem:[%s3410_s1 + $0x48] sm:$0x3f]   ;;  %v526_v26 = vshll.u32 %v2975_v13, 16  ;;  %v657_v21 = vlaneseq }
  0x1a   :  { %v2824_v27 = vld [vmem:[%s3410_s1 + $0x70] sm:$0xff]   ;;  %v336_v28 = vsel %vm66_vm0, %v2820_v24, 0  ;;  %v2826_v30 = vld [vmem:[%s3410_s1 + $0x78] sm:$0x3f]   ;;  %v524_v32 = vshrl.u32 %v2975_v13, 16  ;;  %v2823_v34 = vld [vmem:[%s3410_s1 + $0x60] sm:$0xff]  }
  0x1b   :  { %v2822_v31 = vld [vmem:[%s3409_s0 + $0x18] sm:$0xff]   ;;  %v528_v33 = vrot.slane %v526_v26, 1  ;;  %v2825_v35 = vld [vmem:[%s3410_s1 + $0x68] sm:$0x3f]   ;;  %v545_v36 = vsel %vm66_vm0, %v2826_v30, 0  ;;  %v2827_v39 = vld [vmem:[%s3410_s1 + $0x80] sm:$0xff]  }
  0x1c   :  { %v474_v38 = vsel %vm66_vm0, %v2825_v35, 0  ;;  %v2828_v40 = vld [vmem:[%s3410_s1 + $0x88] sm:$0x3f]   ;;  %v2829_v43 = vld [vmem:[%s3411_s2] sm:$0xff]   ;;  %v2831_v55 = vld [vmem:[%s3411_s2 + $0x10] ss:$0 sps:$4 sm:$0xff]  }
  0x1d   :  { %v529_v37 = vor.u32 %v528_v33, %v524_v32  ;;  %v612_v41 = vsel %vm66_vm0, %v2828_v40, 0  ;;  %v2830_v50 = vld [vmem:[%s3411_s2 + $0x8] sm:$0xff]   ;;  %vm699_vm3 = vcmask 1043456   ;;  %v2835_v61 = vld [vmem:[%s3411_s2 + $0x14] sm:$0xff]   ;;  %v2836_v62 = vld [vmem:[%s3411_s2 + $0x1c] sm:$0xff]   ;;  %v3104_v26 = vshrl.u32 %v657_v21, 7 }
  0x1e   :  { %v763_v56 = vsel %vm699_vm3, %v2831_v55, 0  ;;  %v2838_v63 = vld [vmem:[%s3411_s2 + $0x24] ss:$0 sps:$4 sm:$0xff]   ;;  %vm695_vm4 = vcmask 326656   ;;  %s2906_s8 = smov 120   ;;  %vm1341_vm5 = vcmask 195584  }
  0x1f   :  { %v701_v0 = vsel %vm699_vm3, %v2838_v63, 0  ;;  %v659_v35 = vsub.s32 0, %v3104_v26  ;;  %v2834_v55 = vld [vmem:[%s3411_s2 + $0x4c] ss:$0 sps:$4 sm:$0xff]   ;;  %v2853_v21 = vld [vmem:[%s3411_s2 + $0xa0] sm:$0xff]   ;;  %vm2148_vm6 = vcmask 1046528  }
  0x20   :  { %v2840_v63 = vld [vmem:[%s3411_s2 + $0x28] sm:$0xff]   ;;  %vm2168_vm7 = vcmask 1040384   ;;  %vm2175_vm8 = vcmask 254976  }
  0x74   :  { %v180_v25 = vpop.permute.xlu0 %179 }
  0x75   :  { %2549 = vmatmul.mubr.msk.bf16.vlgmr.msra.gmra.mrb[4].mxu0 %vm62_vm2, %v180_v25 }
  0x76   :  { %2561 = vmatpush3.bf16.msra.mxu0 %v2818_v23  ;;  %2564 = vmatprep.mubr.msk.bf16.mxu0 %vm2904_vm1, %v2903_v4 }
  0x77   :  { %2562 = vmatprep.subr.bf16.mxu0 %v2903_v4 }
  0x78   :  { %v387_v29 = vpop.permute.xlu0 %386 }
  0x79   :  { %2573 = vmatmul.mubr.msk.bf16.vlgmr.msra.gmra.mrb[8].mxu1 %vm62_vm2, %v387_v29 }
  0x7a   :  { %2563 = vmatpush3.bf16.msra.mxu0 %v336_v28  ;;  %2585 = vmatpush3.bf16.msra.mxu1 %v2824_v27  ;;  %v596_v42 = vpop.permute.xlu1 %595 }
  0x7b   :  { %2576 = vmatprep.subr.bf16.mxu0 %v2903_v4  ;;  %2586 = vmatprep.subr.bf16.mxu1 %v2903_v4 }
  0x7c   :  { %2588 = vmatprep.mubr.msk.bf16.mxu1 %vm2904_vm1, %v2903_v4 }
  0x7d   :  { %2565 = vmatmul.mubr.msk.bf16.vlgmr.msra.gmra.mrb[8].mxu0 %vm62_vm2, %v2822_v31 }
  0x7e   :  { %2577 = vmatpush3.bf16.msra.mxu0 %v2823_v34  ;;  %2580 = vmatprep.mubr.msk.bf16.mxu0 %vm2904_vm1, %v2903_v4 }
  0x7f   :  { %2578 = vmatprep.subr.bf16.mxu0 %v2903_v4  ;;  %2587 = vmatpush3.bf16.msra.mxu1 %v545_v36  ;;  %v3110_v36 = vld [vmem:[%s3414_s5] sm:$0x3f]  ;;  %s2905_s5 = smov 112  }
  0x80   :  { %2600 = vmatprep.subr.bf16.mxu1 %v2903_v4 }
  0x82   :  { %2579 = vmatpush3.bf16.msra.mxu0 %v474_v38  ;;  %2589 = vmatmul.mubr.msk.bf16.vlgmr.msra.gmra.mrb[12].mxu1 %vm62_vm2, %v529_v37  ;;  %v660_v38 = vrot.slane %v3110_v36, %v659_v35  ;;  %v2856_v35 = vld [vmem:[%s3412_s3] sm:$0xff]  }
  0x83   :  { %2592 = vmatprep.subr.bf16.mxu0 %v2903_v4  ;;  %2606 = vmatprep.mubr.msk.bf16.mxu1 %vm2904_vm1, %v2903_v4 }
  0x84   :  { %2601 = vmatpush3.bf16.msra.mxu1 %v2835_v61  ;;  %v2841_v61 = vld [vmem:[%s3411_s2 + $0x74] ss:$0 sps:$4 sm:$0xff]  }
  0x85   :  { %2581 = vmatmul.mubr.msk.bf16.vlgmr.msra.gmra.mrb[12].mxu0 %vm62_vm2, %v2960_v9  ;;  %2602 = vmatprep.subr.bf16.mxu1 %v2903_v4 }
  0x86   :  { %2593 = vmatpush3.bf16.msra.mxu0 %v2827_v39  ;;  %2596 = vmatprep.mubr.msk.bf16.mxu0 %vm2904_vm1, %v2903_v4 }
  0x87   :  { %2594 = vmatprep.subr.bf16.mxu0 %v2903_v4 }
  0x88   :  { %2603 = vmatpush3.bf16.msra.mxu1 %v2836_v62  ;;  %v1053_v62 = vsel %vm699_vm3, %v2841_v61, 0 }
  0x89   :  { %2604 = vmatprep.subr.bf16.mxu1 %v2903_v4 }
  0x8a   :  { %2595 = vmatpush3.bf16.msra.mxu0 %v612_v41 }
  0x8b   :  { %2610 = vmatprep.subr.bf16.mxu0 %v2903_v4 }
  0x8c   :  { %2605 = vmatpush3.bf16.msra.mxu1 %v701_v0 }
  0x8d   :  { %2597 = vmatmul.mubr.msk.bf16.vlgmr.msra.gmra.mrb[16].mxu0 %vm62_vm2, %v596_v42  ;;  %2620 = vmatprep.subr.bf16.mxu1 %v2903_v4 }
  0x8e   :  { %2616 = vmatprep.mubr.msk.bf16.mxu0 %vm2904_vm1, %v2903_v4  ;;  %2611 = vmatpush3.bf16.msra.mxu0 %v2829_v43 }
  0x8f   :  { %2612 = vmatprep.subr.bf16.mxu0 %v2903_v4 }
  0x92   :  { %2613 = vmatpush3.bf16.msra.mxu0 %v2830_v50  ;;  %v2832_v50 = vld [vmem:[%s3411_s2 + $0x3c] sm:$0xff]  }
  0x93   :  { %2614 = vmatprep.subr.bf16.mxu0 %v2903_v4 }
  0x96   :  { %2615 = vmatpush3.bf16.msra.mxu0 %v763_v56 }
  0x97   :  { %2630 = vmatprep.subr.bf16.mxu0 %v2903_v4 }
  0xdd   :  { %v104_v44 = vpop.f32.mrb[0].mxu0  ;;  %v167_v46 = vpop.f32.mrb[0].mxu1 }
  0xde   :  { %v2534_v45 = vpop.f32.mrb[1].mxu0  ;;  %v168_v47 = vadd.f32 %v167_v46, %v104_v44  ;;  %v2542_v49 = vpop.f32.mrb[1].mxu1 }
  0xdf   :  { %v107_v48 = vpop.f32.mrb[2].mxu0  ;;  %v170_v52 = vpop.f32.mrb[2].mxu1 }
  0xe0   :  { %v2535_v51 = vpop.f32.mrb[3].mxu0  ;;  %v171_v53 = vadd.f32 %v170_v52, %v107_v48  ;;  %v2543_v54 = vpop.f32.mrb[3].mxu1  ;;  %v2833_v52 = vld [vmem:[%s3411_s2 + $0x44] sm:$0xff]  }
  0xe5   :  { %v302_v57 = vpop.f32.mrb[4].mxu1 }
  0xe6   :  { %v2558_v58 = vpop.f32.mrb[5].mxu1 }
  0xe7   :  { %v305_v59 = vpop.f32.mrb[6].mxu1 }
  0xe8   :  { %v2559_v60 = vpop.f32.mrb[7].mxu1 }
  0xe9   :  { %v2839_v60 = vld [vmem:[%s3411_s2 + $0x6c] sm:$0xff]  }
 0x148   :  { %v232_v1 = vpop.f32.mrb[4].mxu0 }
 0x149   :  { %v239_v2 = vadd.f32 %v232_v1, %v168_v47  ;;  %v2550_v3 = vpop.f32.mrb[5].mxu0 }
 0x14a   :  { %v235_v5 = vpop.f32.mrb[6].mxu0  ;;  %v2844_v3 = vld [vmem:[%s3411_s2 + $0x38] ss:$0 sps:$4 sm:$0xff]  }
 0x14b   :  { %v240_v6 = vadd.f32 %v235_v5, %v171_v53  ;;  %v309_v7 = vadd.f32 %v302_v57, %v239_v2  ;;  %v2551_v8 = vpop.f32.mrb[7].mxu0  ;;  %v909_v57 = vsel %vm699_vm3, %v2834_v55, 0  ;;  %v2842_v2 = vld [vmem:[%s3411_s2 + $0x30] sm:$0xff]  }
 0x14c   :  { %v439_v9 = vpop.f32.mrb[8].mxu1  ;;  %v2843_v5 = vld [vmem:[%s3411_s2 + $0x8c] sm:$0xff]   ;;  %v2845_v8 = vld [vmem:[%s3411_s2 + $0x94] sm:$0xff]  }
 0x14d   :  { %v310_v10 = vadd.f32 %v305_v59, %v240_v6  ;;  %v2574_v11 = vpop.f32.mrb[9].mxu1  ;;  %v2837_v59 = vld [vmem:[%s3411_s2 + $0x64] sm:$0xff]  }
 0x14e   :  { %v442_v12 = vpop.f32.mrb[10].mxu1 }
 0x14f   :  { %v2575_v13 = vpop.f32.mrb[11].mxu1 }
 0x150   :  { %v372_v14 = vpop.f32.mrb[8].mxu0  ;;  %v2848_v13 = vld [vmem:[%s3411_s2 + $0x58] sm:$0xff]  }
 0x151   :  { %v379_v15 = vadd.f32 %v372_v14, %v309_v7  ;;  %v2566_v16 = vpop.f32.mrb[9].mxu0  ;;  %v833_v7 = vsel %vm699_vm3, %v2844_v3, 0  ;;  %v2849_v14 = vld [vmem:[%s3411_s2 + $0x60] ss:$0 sps:$4 sm:$0xff]  }
 0x152   :  { %v375_v17 = vpop.f32.mrb[10].mxu0  ;;  %v981_v16 = vsel %vm699_vm3, %v2849_v14, 0 }
 0x153   :  { %v380_v18 = vadd.f32 %v375_v17, %v310_v10  ;;  %v446_v19 = vadd.f32 %v439_v9, %v379_v15  ;;  %v2567_v20 = vpop.f32.mrb[11].mxu0  ;;  %v2847_v9 = vld [vmem:[%s3411_s2 + $0x9c] ss:$0 sps:$4 sm:$0xff]   ;;  %v2846_v10 = vld [vmem:[%s3411_s2 + $0x50] sm:$0xff]  }
 0x154   :  { %v2850_v17 = vld [vmem:[%s3411_s2 + $0x78] sm:$0xff]  }
 0x155   :  { %v447_v22 = vadd.f32 %v442_v12, %v380_v18  ;;  %v581_v23 = vpop.f32.mrb[12].mxu1  ;;  %v1196_v12 = vsel %vm699_vm3, %v2847_v9, 0  ;;  %v2851_v18 = vld [vmem:[%s3411_s2 + $0x80] sm:$0xff]  }
 0x156   :  { %v2590_v24 = vpop.f32.mrb[13].mxu1 }
 0x157   :  { %v584_v25 = vpop.f32.mrb[14].mxu1 }
 0x158   :  { %v510_v27 = vpop.f32.mrb[12].mxu0  ;;  %v2591_v28 = vpop.f32.mrb[15].mxu1 }
 0x159   :  { %v517_v29 = vadd.f32 %v510_v27, %v446_v19  ;;  %v2582_v30 = vpop.f32.mrb[13].mxu0  ;;  %v2852_v19 = vld [vmem:[%s3411_s2 + $0x88] ss:$0 sps:$4 sm:$0xff]  }
 0x15a   :  { %v513_v31 = vpop.f32.mrb[14].mxu0  ;;  %v1124_v20 = vsel %vm699_vm3, %v2852_v19, 0 }
 0x15b   :  { %v518_v32 = vadd.f32 %v513_v31, %v447_v22  ;;  %v588_v33 = vadd.f32 %v581_v23, %v517_v29  ;;  %v2583_v34 = vpop.f32.mrb[15].mxu0  ;;  %v2854_v22 = vld [vmem:[%s3411_s2 + $0xa8] sm:$0xff]   ;;  %v2855_v23 = vld [vmem:[%s3411_s2 + $0xb0] ss:$0 sps:$4 sm:$0xff]  }
 0x15c   :  { %v1268_v24 = vsel %vm699_vm3, %v2855_v23, 0 }
 0x15d   :  { %v589_v37 = vadd.f32 %v584_v25, %v518_v32 }
 0x160   :  { %v648_v39 = vpop.f32.mrb[16].mxu0 }
 0x161   :  { %v655_v40 = vadd.f32 %v648_v39, %v588_v33  ;;  %v2598_v41 = vpop.f32.mrb[17].mxu0  ;;  %v2860_v39 = vld [vmem:[%s3412_s3 + $0xc] sm:$0xff]  }
 0x162   :  { %v651_v42 = vpop.f32.mrb[18].mxu0 }
 0x163   :  { %v661_v43 = vadd.f32 %v660_v38, %v655_v40  ;;  %v656_v44 = vadd.f32 %v651_v42, %v589_v37  ;;  %v2599_v45 = vpop.f32.mrb[19].mxu0  ;;  %v2857_v37 = vld [vmem:[%s3412_s3 + $0x8] ss:$0 sps:$4 sm:$0xff]   ;;  %v2861_v40 = vld [vmem:[%s3412_s3 + $0x14] ss:$0 sps:$4 sm:$0xff]  }
 0x164   :  { %v1346_v41 = vsel %vm699_vm3, %v2861_v40, 0  ;;  %v2864_v40 = vld [vmem:[%s3412_s3 + $0x44] ss:$0 sps:$4 sm:$0xff]  }
 0x165   :  { %v662_v46 = vadd.f32 %v660_v38, %v656_v44  ;;  %v663_v47 = vmax.f32 %v661_v43, 0.0  ;;  %v1402_v38 = vsel %vm699_vm3, %v2857_v37, 0 }
 0x167   :  { %v664_v48 = vmax.f32 %v662_v46, 0.0 }
 0x169   :  { %v665_v49 = vpack.c.bf16 %v664_v48, %v663_v47 }
 0x16b   :  { %812 = vrot.lane.b32.xlu0 %v665_v49, %s2905_s5  ;;  %678 = vrot.lane.b32.xlu1 %v665_v49, %s2906_s8  ;;  %v886_v51 = vshll.u32 %v665_v49, 16  ;;  %v884_v53 = vshrl.u32 %v665_v49, 16  ;;  %v3132_v58 = vrot.slane %v665_v49, 1 }
 0x16c   :  { %2617 = vmatmul.mubr.msk.bf16.vlgmr.msra.gmra.mrb[20].mxu0 %vm695_vm4, %v665_v49 }
 0x16d   :  { %2631 = vmatpush3.bf16.msra.mxu0 %v2832_v50  ;;  %v888_v54 = vrot.slane %v886_v51, 1  ;;  %2636 = vmatprep.mubr.msk.bf16.mxu0 %vm2904_vm1, %v2903_v4 }
 0x16e   :  { %2632 = vmatprep.subr.bf16.mxu0 %v2903_v4 }
 0x16f   :  { %v889_v56 = vor.u32 %v888_v54, %v884_v53 }
 0x171   :  { %2633 = vmatpush3.bf16.msra.mxu0 %v2833_v52  ;;  %1032 = vrot.lane.b32.xlu0 %v889_v56, %s2905_s5 }
 0x172   :  { %960 = vrot.lane.b32.xlu1 %v889_v56, %s2906_s8  ;;  %2634 = vmatprep.subr.bf16.mxu0 %v2903_v4 }
 0x175   :  { %2635 = vmatpush3.bf16.msra.mxu0 %v909_v57  ;;  %1247 = vrot.lane.b32.xlu0 %v3132_v58, %s2905_s5 }
 0x176   :  { %1175 = vrot.lane.b32.xlu1 %v3132_v58, %s2906_s8  ;;  %2650 = vmatprep.subr.bf16.mxu0 %v2903_v4 }
 0x178   :  { %2637 = vmatmul.mubr.msk.bf16.vlgmr.msra.gmra.mrb[24].mxu0 %vm695_vm4, %v889_v56 }
 0x179   :  { %2651 = vmatpush3.bf16.msra.mxu0 %v2837_v59  ;;  %2656 = vmatprep.mubr.msk.bf16.mxu0 %vm2904_vm1, %v2903_v4 }
 0x17a   :  { %2652 = vmatprep.subr.bf16.mxu0 %v2903_v4 }
 0x17d   :  { %2653 = vmatpush3.bf16.msra.mxu0 %v2839_v60 }
 0x17e   :  { %2654 = vmatprep.subr.bf16.mxu0 %v2903_v4 }
 0x181   :  { %2655 = vmatpush3.bf16.msra.mxu0 %v1053_v62 }
 0x182   :  { %2670 = vmatprep.subr.bf16.mxu0 %v2903_v4 }
 0x1dd   :  { %v679_v0 = vpop.permute.xlu1 %678  ;;  %v813_v1 = vpop.permute.xlu0 %812 }
 0x1de   :  { %2607 = vmatmul.mubr.msk.bf16.vlgmr.msra.gmra.mrb[16].mxu1 %vm695_vm4, %v679_v0 }
 0x1df   :  { %2621 = vmatpush3.bf16.msra.mxu1 %v2840_v63  ;;  %2626 = vmatprep.mubr.msk.bf16.mxu1 %vm2904_vm1, %v2903_v4 }
 0x1e0   :  { %2622 = vmatprep.subr.bf16.mxu1 %v2903_v4 }
 0x1e3   :  { %2623 = vmatpush3.bf16.msra.mxu1 %v2842_v2  ;;  %v1033_v6 = vpop.permute.xlu0 %1032 }
 0x1e4   :  { %2657 = vmatmul.mubr.msk.bf16.vlgmr.msra.gmra.mrb[28].mxu0 %vm695_vm4, %v1033_v6  ;;  %2624 = vmatprep.subr.bf16.mxu1 %v2903_v4  ;;  %v961_v11 = vpop.permute.xlu1 %960 }
 0x1e5   :  { %2671 = vmatpush3.bf16.msra.mxu0 %v2843_v5  ;;  %2676 = vmatprep.mubr.msk.bf16.mxu0 %vm2904_vm1, %v2903_v4 }
 0x1e6   :  { %2672 = vmatprep.subr.bf16.mxu0 %v2903_v4 }
 0x1e7   :  { %2625 = vmatpush3.bf16.msra.mxu1 %v833_v7  ;;  %v1248_v25 = vpop.permute.xlu0 %1247 }
 0x1e8   :  { %2640 = vmatprep.subr.bf16.mxu1 %v2903_v4  ;;  %v1176_v15 = vpop.permute.xlu1 %1175 }
 0x1e9   :  { %2673 = vmatpush3.bf16.msra.mxu0 %v2845_v8 }
 0x1ea   :  { %2627 = vmatmul.mubr.msk.bf16.vlgmr.msra.gmra.mrb[20].mxu1 %vm695_vm4, %v813_v1  ;;  %2674 = vmatprep.subr.bf16.mxu0 %v2903_v4 }
 0x1eb   :  { %2641 = vmatpush3.bf16.msra.mxu1 %v2846_v10  ;;  %2646 = vmatprep.mubr.msk.bf16.mxu1 %vm2904_vm1, %v2903_v4 }
 0x1ec   :  { %2642 = vmatprep.subr.bf16.mxu1 %v2903_v4 }
 0x1ed   :  { %2675 = vmatpush3.bf16.msra.mxu0 %v1196_v12 }
 0x1ee   :  { %2690 = vmatprep.subr.bf16.mxu0 %v2903_v4 }
 0x1ef   :  { %2643 = vmatpush3.bf16.msra.mxu1 %v2848_v13 }
 0x1f0   :  { %2677 = vmatmul.mubr.msk.bf16.vlgmr.msra.gmra.mrb[32].mxu0 %vm695_vm4, %v1176_v15  ;;  %2644 = vmatprep.subr.bf16.mxu1 %v2903_v4 }
 0x1f1   :  { %2694 = vmatprep.mubr.msk.bf16.mxu0 %vm2904_vm1, %v2903_v4  ;;  %2691 = vmatpush3.bf16.msra.mxu0 %v2860_v39  ;;  %v2862_v39 = vld [vmem:[%s3412_s3 + $0x3c] sm:$0xff]  }
 0x1f2   :  { %2692 = vmatprep.subr.bf16.mxu0 %v2903_v4 }
 0x1f3   :  { %2645 = vmatpush3.bf16.msra.mxu1 %v981_v16 }
 0x1f4   :  { %2660 = vmatprep.subr.bf16.mxu1 %v2903_v4 }
 0x1f5   :  { %2693 = vmatpush3.bf16.msra.mxu0 %v1346_v41 }
 0x1f6   :  { %2647 = vmatmul.mubr.msk.bf16.vlgmr.msra.gmra.mrb[24].mxu1 %vm695_vm4, %v961_v11  ;;  %2706 = vmatprep.subr.bf16.mxu0 %v2903_v4 }
 0x1f7   :  { %2661 = vmatpush3.bf16.msra.mxu1 %v2850_v17  ;;  %2666 = vmatprep.mubr.msk.bf16.mxu1 %vm2904_vm1, %v2903_v4  ;;  %v1315_v17 = vsub.s32 1, %v3104_v26 }
 0x1f8   :  { %2662 = vmatprep.subr.bf16.mxu1 %v2903_v4 }
 0x1fb   :  { %2663 = vmatpush3.bf16.msra.mxu1 %v2851_v18  ;;  %v1316_v18 = vrot.slane %v3110_v36, %v1315_v17  ;;  %v2415_v17 = vld [vmem:[%s3413_s4 + $0x28] sm:$0xff] }
 0x1fc   :  { %2664 = vmatprep.subr.bf16.mxu1 %v2903_v4 }
 0x1ff   :  { %2665 = vmatpush3.bf16.msra.mxu1 %v1124_v20 }
 0x200   :  { %2680 = vmatprep.subr.bf16.mxu1 %v2903_v4 }
 0x202   :  { %2667 = vmatmul.mubr.msk.bf16.vlgmr.msra.gmra.mrb[28].mxu1 %vm695_vm4, %v3132_v58 }
 0x203   :  { %2681 = vmatpush3.bf16.msra.mxu1 %v2853_v21  ;;  %2686 = vmatprep.mubr.msk.bf16.mxu1 %vm2904_vm1, %v2903_v4 }
 0x204   :  { %2682 = vmatprep.subr.bf16.mxu1 %v2903_v4 }
 0x207   :  { %2683 = vmatpush3.bf16.msra.mxu1 %v2854_v22 }
 0x208   :  { %2684 = vmatprep.subr.bf16.mxu1 %v2903_v4 }
 0x20b   :  { %2685 = vmatpush3.bf16.msra.mxu1 %v1268_v24 }
 0x20c   :  { %2698 = vmatprep.subr.bf16.mxu1 %v2903_v4 }
 0x20e   :  { %2687 = vmatmul.mubr.msk.bf16.vlgmr.msra.gmra.mrb[32].mxu1 %vm695_vm4, %v1248_v25 }
 0x20f   :  { %2702 = vmatprep.mubr.msk.bf16.mxu1 %vm2904_vm1, %v2903_v4  ;;  %2699 = vmatpush3.bf16.msra.mxu1 %v2856_v35 }
 0x210   :  { %2700 = vmatprep.subr.bf16.mxu1 %v2903_v4 }
 0x213   :  { %2701 = vmatpush3.bf16.msra.mxu1 %v1402_v38 }
 0x214   :  { %2714 = vmatprep.subr.bf16.mxu1 %v2903_v4 }
 0x23f   :  { %v799_v27 = vpop.f32.mrb[20].mxu0 }
 0x240   :  { %v2618_v28 = vpop.f32.mrb[21].mxu0 }
 0x241   :  { %v802_v29 = vpop.f32.mrb[22].mxu0 }
 0x242   :  { %v2619_v30 = vpop.f32.mrb[23].mxu0 }
 0x24b   :  { %v945_v31 = vpop.f32.mrb[24].mxu0 }
 0x24c   :  { %v2638_v32 = vpop.f32.mrb[25].mxu0 }
 0x24d   :  { %v948_v33 = vpop.f32.mrb[26].mxu0  ;;  %v2859_v32 = vld [vmem:[%s3412_s3 + $0x2c] ss:$0 sps:$4 sm:$0xff]  }
 0x24e   :  { %v2639_v34 = vpop.f32.mrb[27].mxu0  ;;  %v1532_v37 = vsel %vm699_vm3, %v2859_v32, 0 }
 0x2b1   :  { %v737_v42 = vpop.f32.mrb[16].mxu1 }
 0x2b2   :  { %v800_v43 = vadd.f32 %v799_v27, %v737_v42  ;;  %v2608_v44 = vpop.f32.mrb[17].mxu1  ;;  %v1660_v42 = vsel %vm699_vm3, %v2864_v40, 0 }
 0x2b3   :  { %v740_v45 = vpop.f32.mrb[18].mxu1  ;;  %v2865_v44 = vld [vmem:[%s3412_s3 + $0x20] ss:$0 sps:$4 sm:$0xff]  }
 0x2b4   :  { %v803_v46 = vadd.f32 %v802_v29, %v740_v45  ;;  %v2609_v47 = vpop.f32.mrb[19].mxu1 }
 0x2b5   :  { %v1464_v47 = vsel %vm699_vm3, %v2865_v44, 0 }
 0x2b7   :  { %v1089_v48 = vpop.f32.mrb[28].mxu0 }
 0x2b8   :  { %v2658_v49 = vpop.f32.mrb[29].mxu0 }
 0x2b9   :  { %v1092_v50 = vpop.f32.mrb[30].mxu0  ;;  %v2868_v49 = vld [vmem:[%s3412_s3 + $0x5c] ss:$0 sps:$4 sm:$0xff]  }
 0x2ba   :  { %v2659_v51 = vpop.f32.mrb[31].mxu0 }
 0x2bb   :  { %v2867_v51 = vld [vmem:[%s3412_s3 + $0x30] sm:$0xff]  }
 0x2bd   :  { %v869_v52 = vpop.f32.mrb[20].mxu1 }
 0x2be   :  { %v876_v53 = vadd.f32 %v869_v52, %v800_v43  ;;  %v2628_v54 = vpop.f32.mrb[21].mxu1  ;;  %v2863_v43 = vld [vmem:[%s3412_s3 + $0x18] sm:$0xff]  }
 0x2bf   :  { %v872_v55 = vpop.f32.mrb[22].mxu1  ;;  %v2869_v52 = vld [vmem:[%s3412_s3 + $0x38] ss:$0 sps:$4 sm:$0xff]   ;;  %v1787_v54 = vsel %vm699_vm3, %v2868_v49, 0 }
 0x2c0   :  { %v877_v56 = vadd.f32 %v872_v55, %v803_v46  ;;  %v2629_v57 = vpop.f32.mrb[23].mxu1  ;;  %v952_v58 = vadd.f32 %v945_v31, %v876_v53  ;;  %v2858_v31 = vld [vmem:[%s3412_s3 + $0x24] sm:$0xff]   ;;  %v1596_v55 = vsel %vm699_vm3, %v2869_v52, 0 }
 0x2c1   :  { %v2870_v57 = vld [vmem:[%s3412_s3 + $0x48] sm:$0xff]  }
 0x2c2   :  { %v953_v59 = vadd.f32 %v948_v33, %v877_v56 }
 0x2c3   :  { %v1232_v60 = vpop.f32.mrb[32].mxu0 }
 0x2c4   :  { %v2678_v61 = vpop.f32.mrb[33].mxu0 }
 0x2c5   :  { %v1235_v62 = vpop.f32.mrb[34].mxu0  ;;  %v2873_v61 = vld [vmem:[%s3412_s3 + $0x68] ss:$0 sps:$4 sm:$0xff]  }
 0x2c6   :  { %v2679_v63 = vpop.f32.mrb[35].mxu0 }
 0x2c9   :  { %v1017_v0 = vpop.f32.mrb[24].mxu1 }
 0x2ca   :  { %v1024_v1 = vadd.f32 %v1017_v0, %v952_v58  ;;  %v2648_v2 = vpop.f32.mrb[25].mxu1  ;;  %v2871_v58 = vld [vmem:[%s3412_s3 + $0x50] ss:$0 sps:$4 sm:$0xff]  }
 0x2cb   :  { %v1020_v3 = vpop.f32.mrb[26].mxu1 }
 0x2cc   :  { %v1025_v5 = vadd.f32 %v1020_v3, %v953_v59  ;;  %v2649_v6 = vpop.f32.mrb[27].mxu1  ;;  %v1096_v7 = vadd.f32 %v1089_v48, %v1024_v1  ;;  %v2866_v48 = vld [vmem:[%s3412_s3 + $0x54] sm:$0xff]   ;;  %v1723_v59 = vsel %vm699_vm3, %v2871_v58, 0  ;;  %v1898_v58 = vsub.s32 2, %v3104_v26 }
 0x2ce   :  { %v1097_v8 = vadd.f32 %v1092_v50, %v1025_v5 }
 0x2d5   :  { %v1160_v9 = vpop.f32.mrb[28].mxu1 }
 0x2d6   :  { %v1167_v10 = vadd.f32 %v1160_v9, %v1096_v7  ;;  %v2668_v11 = vpop.f32.mrb[29].mxu1  ;;  %v1904_v9 = vld [vmem:[%s3413_s4] sm:$0xff] }
 0x2d7   :  { %v1163_v12 = vpop.f32.mrb[30].mxu1  ;;  %v2413_v11 = vld [vmem:[%s3413_s4 + $0x18] sm:$0xff] }
 0x2d8   :  { %v1168_v13 = vadd.f32 %v1163_v12, %v1097_v8  ;;  %v2669_v14 = vpop.f32.mrb[31].mxu1  ;;  %v1239_v15 = vadd.f32 %v1232_v60, %v1167_v10  ;;  %v2872_v60 = vld [vmem:[%s3412_s3 + $0x60] sm:$0xff]  }
 0x2d9   :  { %v2414_v12 = vld [vmem:[%s3413_s4 + $0x20] sm:$0xff]  ;;  %v1906_v14 = vld [vmem:[%s3413_s4 + $0x10] sm:$0xff] }
 0x2da   :  { %v1240_v16 = vadd.f32 %v1235_v62, %v1168_v13  ;;  %v1851_v62 = vsel %vm699_vm3, %v2873_v61, 0  ;;  %v2793_v13 = vpack.c.bf16 %v2414_v12, %v2413_v11 }
 0x2e1   :  { %v1304_v19 = vpop.f32.mrb[32].mxu1 }
 0x2e2   :  { %v1311_v20 = vadd.f32 %v1304_v19, %v1239_v15  ;;  %v2688_v21 = vpop.f32.mrb[33].mxu1  ;;  %v2418_v15 = vld [vmem:[%s3413_s4 + $0x30] sm:$0xff] }
 0x2e3   :  { %v1307_v22 = vpop.f32.mrb[34].mxu1 }
 0x2e4   :  { %v1317_v23 = vadd.f32 %v1316_v18, %v1311_v20  ;;  %v1312_v24 = vadd.f32 %v1307_v22, %v1240_v16  ;;  %v2689_v25 = vpop.f32.mrb[35].mxu1  ;;  %v2419_v16 = vld [vmem:[%s3413_s4 + $0x38] sm:$0xff] }
 0x2e6   :  { %v1318_v27 = vadd.f32 %v1316_v18, %v1312_v24  ;;  %v1319_v28 = vmax.f32 %v1317_v23, 0.0  ;;  %v2797_v18 = vpack.c.bf16 %v2419_v16, %v2418_v15 }
 0x2e8   :  { %v1320_v29 = vmax.f32 %v1318_v27, 0.0 }
 0x2ea   :  { %v1321_v30 = vpack.c.bf16 %v1320_v29, %v1319_v28 }
 0x2ec   :  { %1449 = vrot.lane.b32.xlu0 %v1321_v30, %s2905_s5  ;;  %1330 = vrot.lane.b32.xlu1 %v1321_v30, %s2906_s8  ;;  %v1515_v33 = vshll.u32 %v1321_v30, 16  ;;  %v1513_v34 = vshrl.u32 %v1321_v30, 16  ;;  %v1709_v41 = vrot.slane %v1321_v30, 1 }
 0x2ed   :  { %2703 = vmatmul.mubr.msk.bf16.vlgmr.msra.gmra.mrb[36].mxu1 %vm1341_vm5, %v1321_v30 }
 0x2ee   :  { %2715 = vmatpush3.bf16.msra.mxu1 %v2858_v31  ;;  %v1517_v35 = vrot.slane %v1515_v33, 1  ;;  %2718 = vmatprep.mubr.msk.bf16.mxu1 %vm2904_vm1, %v2903_v4 }
 0x2ef   :  { %2716 = vmatprep.subr.bf16.mxu1 %v2903_v4 }
 0x2f0   :  { %v1518_v38 = vor.u32 %v1517_v35, %v1513_v34 }
 0x2f2   :  { %2717 = vmatpush3.bf16.msra.mxu1 %v1532_v37  ;;  %1645 = vrot.lane.b32.xlu0 %v1518_v38, %s2905_s5 }
 0x2f3   :  { %1581 = vrot.lane.b32.xlu1 %v1518_v38, %s2906_s8  ;;  %2730 = vmatprep.subr.bf16.mxu1 %v2903_v4 }
 0x2f5   :  { %2719 = vmatmul.mubr.msk.bf16.vlgmr.msra.gmra.mrb[40].mxu1 %vm1341_vm5, %v1518_v38 }
 0x2f6   :  { %1836 = vrot.lane.b32.xlu0 %v1709_v41, %s2905_s5  ;;  %2731 = vmatpush3.bf16.msra.mxu1 %v2862_v39 }
 0x2f7   :  { %1772 = vrot.lane.b32.xlu1 %v1709_v41, %s2906_s8  ;;  %2732 = vmatprep.subr.bf16.mxu1 %v2903_v4 }
 0x2f8   :  { %2734 = vmatprep.mubr.msk.bf16.mxu1 %vm2904_vm1, %v2903_v4 }
 0x2fa   :  { %2733 = vmatpush3.bf16.msra.mxu1 %v1660_v42 }
 0x2fb   :  { %2746 = vmatprep.subr.bf16.mxu1 %v2903_v4 }
 0x35e   :  { %v1331_v45 = vpop.permute.xlu1 %1330  ;;  %v1450_v46 = vpop.permute.xlu0 %1449 }
 0x35f   :  { %2695 = vmatmul.mubr.msk.bf16.vlgmr.msra.gmra.mrb[36].mxu0 %vm1341_vm5, %v1331_v45 }
 0x360   :  { %2707 = vmatpush3.bf16.msra.mxu0 %v2863_v43  ;;  %2710 = vmatprep.mubr.msk.bf16.mxu0 %vm2904_vm1, %v2903_v4 }
 0x361   :  { %2708 = vmatprep.subr.bf16.mxu0 %v2903_v4 }
 0x364   :  { %2709 = vmatpush3.bf16.msra.mxu0 %v1464_v47  ;;  %v1646_v50 = vpop.permute.xlu0 %1645 }
 0x365   :  { %2735 = vmatmul.mubr.msk.bf16.vlgmr.msra.gmra.mrb[44].mxu1 %vm1341_vm5, %v1646_v50  ;;  %2722 = vmatprep.subr.bf16.mxu0 %v2903_v4  ;;  %v1582_v53 = vpop.permute.xlu1 %1581 }
 0x366   :  { %2747 = vmatpush3.bf16.msra.mxu1 %v2866_v48  ;;  %2750 = vmatprep.mubr.msk.bf16.mxu1 %vm2904_vm1, %v2903_v4 }
 0x367   :  { %2711 = vmatmul.mubr.msk.bf16.vlgmr.msra.gmra.mrb[40].mxu0 %vm1341_vm5, %v1450_v46  ;;  %2748 = vmatprep.subr.bf16.mxu1 %v2903_v4 }
 0x368   :  { %2723 = vmatpush3.bf16.msra.mxu0 %v2867_v51  ;;  %2726 = vmatprep.mubr.msk.bf16.mxu0 %vm2904_vm1, %v2903_v4  ;;  %v1837_v63 = vpop.permute.xlu0 %1836 }
 0x369   :  { %2724 = vmatprep.subr.bf16.mxu0 %v2903_v4  ;;  %v1773_v56 = vpop.permute.xlu1 %1772 }
 0x36a   :  { %2749 = vmatpush3.bf16.msra.mxu1 %v1787_v54 }
 0x36c   :  { %2725 = vmatpush3.bf16.msra.mxu0 %v1596_v55 }
 0x36d   :  { %2751 = vmatmul.mubr.msk.bf16.vlgmr.msra.gmra.mrb[48].mxu1 %vm1341_vm5, %v1773_v56  ;;  %2738 = vmatprep.subr.bf16.mxu0 %v2903_v4 }
 0x36f   :  { %2727 = vmatmul.mubr.msk.bf16.vlgmr.msra.gmra.mrb[44].mxu0 %vm1341_vm5, %v1582_v53 }
 0x370   :  { %2739 = vmatpush3.bf16.msra.mxu0 %v2870_v57  ;;  %2742 = vmatprep.mubr.msk.bf16.mxu0 %vm2904_vm1, %v2903_v4 }
 0x371   :  { %2740 = vmatprep.subr.bf16.mxu0 %v2903_v4 }
 0x374   :  { %2741 = vmatpush3.bf16.msra.mxu0 %v1723_v59 }
 0x375   :  { %2754 = vmatprep.subr.bf16.mxu0 %v2903_v4 }
 0x377   :  { %2743 = vmatmul.mubr.msk.bf16.vlgmr.msra.gmra.mrb[48].mxu0 %vm1341_vm5, %v1709_v41 }
 0x378   :  { %2755 = vmatpush3.bf16.msra.mxu0 %v2872_v60  ;;  %2758 = vmatprep.mubr.msk.bf16.mxu0 %vm2904_vm1, %v2903_v4  ;;  %v1899_v60 = vrot.slane %v3110_v36, %v1898_v58 }
 0x379   :  { %2756 = vmatprep.subr.bf16.mxu0 %v2903_v4  ;;  %v1905_v4 = vld [vmem:[%s3413_s4 + $0x8] sm:$0xff] }
 0x37a   :  { %v2789_v10 = vpack.c.bf16 %v1905_v4, %v1904_v9 }
 0x37c   :  { %2757 = vmatpush3.bf16.msra.mxu0 %v1851_v62  ;;  %2790 = vmatprep.subr.bf16.mxu1 %v2789_v10 }
 0x37d   :  { %2792 = vmatpush3.bf16.msra.mxu1 %v2789_v10  ;;  %2794 = vmatprep.subr.bf16.mxu0 %v2793_v13 }
 0x37e   :  { %2766 = vmatprep.subr.mxu1 %v1906_v14 }
 0x37f   :  { %2759 = vmatmul.mubr.msk.bf16.vlgmr.msra.gmra.mrb[52].mxu0 %vm1341_vm5, %v1837_v63 }
 0x380   :  { %2796 = vmatpush3.bf16.msra.mxu0 %v2793_v13 }
 0x381   :  { %2767 = vmatpush3.msra.mxu1 %v1906_v14  ;;  %2775 = vmatprep.subr.mxu0 %v2415_v17 }
 0x382   :  { %2798 = vmatprep.subr.bf16.mxu1 %v2797_v18 }
 0x384   :  { %2776 = vmatpush3.msra.mxu0 %v2415_v17 }
 0x3c0   :  { %v1438_v0 = vpop.f32.mrb[36].mxu1 }
 0x3c1   :  { %v2704_v1 = vpop.f32.mrb[37].mxu1 }
 0x3c2   :  { %v1441_v2 = vpop.f32.mrb[38].mxu1 }
 0x3c3   :  { %v2705_v3 = vpop.f32.mrb[39].mxu1 }
 0x3c8   :  { %v1568_v5 = vpop.f32.mrb[40].mxu1 }
 0x3c9   :  { %v2720_v6 = vpop.f32.mrb[41].mxu1 }
 0x3ca   :  { %v1571_v7 = vpop.f32.mrb[42].mxu1 }
 0x3cb   :  { %v2721_v8 = vpop.f32.mrb[43].mxu1 }
 0x3cc   :  { %v2420_v8 = vld [vmem:[%s3413_s4 + $0x40] sm:$0xff]  ;;  %s2907_s4 = smov [#allocation2]  }
 0x3cd   :  { %s2207_s19 = sshll.u32 %s2907_s4, 4  ;;  %s2208_s19 = int_to_ptr.vmem [resolvable:$true] %s2207_s19 }
 0x3ce   :  { %s2878_s20 = scalar_lea.vmem %s2208_s19, 32  ;;  %p2883_p1 = scmp.lt.s32.totalorder %s2208_s19, %s2208_s19 }
 0x3cf   :  { %p2879_p0 = scmp.ne.s32.totalorder %s2208_s19, %s2878_s20  ;;  %p2884_p2 = scmp.lt.s32.totalorder %s2878_s20, %s2878_s20 }
 0x3d1   :  { %p2885_p3 = por %p2884_p2, %p2883_p1 }
 0x3d3   :  { %p2886_p4 = pnand %p2885_p3, %p2879_p0 }
 0x432   :  { %v1382_v19 = vpop.f32.mrb[36].mxu0 }
 0x433   :  { %v1439_v20 = vadd.f32 %v1438_v0, %v1382_v19  ;;  %v2696_v21 = vpop.f32.mrb[37].mxu0  ;;  %v2172_v19 = vsub.s32 3, %v3104_v26 }
 0x434   :  { %v1385_v22 = vpop.f32.mrb[38].mxu0 }
 0x435   :  { %v1442_v23 = vadd.f32 %v1441_v2, %v1385_v22  ;;  %v2697_v24 = vpop.f32.mrb[39].mxu0 }
 0x436   :  { %v2173_v24 = vrot.slane %v3110_v36, %v2172_v19 }
 0x438   :  { %v1696_v25 = vpop.f32.mrb[44].mxu1 }
 0x439   :  { %v2736_v27 = vpop.f32.mrb[45].mxu1 }
 0x43a   :  { %v1500_v28 = vpop.f32.mrb[40].mxu0  ;;  %v1699_v29 = vpop.f32.mrb[46].mxu1 }
 0x43b   :  { %v1507_v30 = vadd.f32 %v1500_v28, %v1439_v20  ;;  %v2712_v31 = vpop.f32.mrb[41].mxu0  ;;  %v2737_v32 = vpop.f32.mrb[47].mxu1 }
 0x43c   :  { %v1503_v33 = vpop.f32.mrb[42].mxu0 }
 0x43d   :  { %v1508_v34 = vadd.f32 %v1503_v33, %v1442_v23  ;;  %v2713_v35 = vpop.f32.mrb[43].mxu0  ;;  %v1575_v37 = vadd.f32 %v1568_v5, %v1507_v30 }
 0x43f   :  { %v1576_v38 = vadd.f32 %v1571_v7, %v1508_v34 }
 0x440   :  { %v1823_v39 = vpop.f32.mrb[48].mxu1 }
 0x441   :  { %v2752_v40 = vpop.f32.mrb[49].mxu1 }
 0x442   :  { %v1632_v41 = vpop.f32.mrb[44].mxu0  ;;  %v1826_v42 = vpop.f32.mrb[50].mxu1  ;;  %v2191_v40 = vsub.s32 4, %v3104_v26 }
 0x443   :  { %v1639_v43 = vadd.f32 %v1632_v41, %v1575_v37  ;;  %v2728_v44 = vpop.f32.mrb[45].mxu0  ;;  %v2753_v45 = vpop.f32.mrb[51].mxu1  ;;  %v2196_v41 = vsub.s32 5, %v3104_v26 }
 0x444   :  { %v1635_v46 = vpop.f32.mrb[46].mxu0 }
 0x445   :  { %v1640_v47 = vadd.f32 %v1635_v46, %v1576_v38  ;;  %v2729_v48 = vpop.f32.mrb[47].mxu0  ;;  %v1703_v49 = vadd.f32 %v1696_v25, %v1639_v43  ;;  %v2197_v45 = vrot.slane %v3110_v36, %v2196_v41 }
 0x447   :  { %v1704_v50 = vadd.f32 %v1699_v29, %v1640_v47 }
 0x44a   :  { %v1759_v51 = vpop.f32.mrb[48].mxu0 }
 0x44b   :  { %v1766_v52 = vadd.f32 %v1759_v51, %v1703_v49  ;;  %v2744_v53 = vpop.f32.mrb[49].mxu0 }
 0x44c   :  { %v1762_v54 = vpop.f32.mrb[50].mxu0 }
 0x44d   :  { %v1767_v55 = vadd.f32 %v1762_v54, %v1704_v50  ;;  %v2745_v56 = vpop.f32.mrb[51].mxu0  ;;  %v1830_v57 = vadd.f32 %v1823_v39, %v1766_v52 }
 0x44f   :  { %v1831_v59 = vadd.f32 %v1826_v42, %v1767_v55  ;;  %v2192_v42 = vrot.slane %v3110_v36, %v2191_v40 }
 0x452   :  { %v1887_v61 = vpop.f32.mrb[52].mxu0 }
 0x453   :  { %v1894_v62 = vadd.f32 %v1887_v61, %v1830_v57  ;;  %v2760_v63 = vpop.f32.mrb[53].mxu0 }
 0x454   :  { %v1890_v0 = vpop.f32.mrb[54].mxu0 }
 0x455   :  { %v1900_v1 = vadd.f32 %v1899_v60, %v1894_v62  ;;  %v1895_v2 = vadd.f32 %v1890_v0, %v1831_v59  ;;  %v2761_v3 = vpop.f32.mrb[55].mxu0 }
 0x457   :  { %v1902_v5 = vmax.f32 %v1900_v1, 0.0  ;;  %v1901_v6 = vadd.f32 %v1899_v60, %v1895_v2 }
 0x459   :  { %v1903_v7 = vmax.f32 %v1901_v6, 0.0  ;;  %2768 = vmatprep.mubr.msk.f32.mxu1 %vm1341_vm5, %v1902_v5  ;;  %2777 = vmatprep.mubr.msk.f32.mxu0 %vm1341_vm5, %v1902_v5 }
 0x45b   :  { %2769 = vmatmul.mubr.msk.f32.vlgmr.msra.gmra.mrb[52].mxu1 %vm1341_vm5, %v1903_v7  ;;  %2778 = vmatmul.mubr.msk.f32.vlgmr.msra.gmra.mrb[56].mxu0 %vm1341_vm5, %v1903_v7 }
 0x45c   :  { %2800 = vmatpush3.bf16.msra.mxu1 %v2797_v18  ;;  %2786 = vmatprep.mubr.msk.f32.mxu1 %vm1341_vm5, %v1902_v5 }
 0x45d   :  { %2784 = vmatprep.subr.mxu1 %v2420_v8 }
 0x460   :  { %2785 = vmatpush3.msra.mxu1 %v2420_v8 }
 0x461   :  { %2787 = vmatmul.mubr.msk.f32.vlgmr.msra.gmra.mrb[54].mxu1 %vm1341_vm5, %v1903_v7 }
 0x52e   :  { %v2770_v9 = vpop.f32.mrb[52].mxu1  ;;  %v2779_v4 = vpop.f32.mrb[56].mxu0 }
 0x52f   :  { %v2150_v10 = vrot.slane %v2779_v4, 1  ;;  %v1979_v11 = vpop.f32.mrb[53].mxu1  ;;  %v2058_v12 = vpop.f32.mrb[57].mxu0 }
 0x530   :  { %v2149_v13 = vrot.slane %v2058_v12, 1 }
 0x531   :  { %v2155_v14 = vadd.f32 %v2770_v9, %v2150_v10 }
 0x532   :  { %v2151_v15 = vsel %vm2148_vm6, %v2149_v13, %v2150_v10 }
 0x533   :  { %v2154_v16 = vadd.f32 %v2151_v15, %v1979_v11 }
 0x534   :  { %v2788_v17 = vpop.f32.mrb[54].mxu1 }
 0x535   :  { %v2159_v18 = vrot.slane %v2788_v17, 2  ;;  %v2137_v20 = vpop.f32.mrb[55].mxu1 }
 0x536   :  { %v2158_v21 = vrot.slane %v2137_v20, 2 }
 0x537   :  { %v2164_v22 = vadd.f32 %v2159_v18, %v2155_v14 }
 0x538   :  { %v2160_v23 = vsel %vm66_vm0, %v2158_v21, %v2159_v18 }
 0x539   :  { %v2166_v25 = vrot.slane %v2164_v22, 7  ;;  %v2163_v27 = vadd.f32 %v2160_v23, %v2154_v16 }
 0x53b   :  { %v2169_v28 = vsel %vm2168_vm7, %v2163_v27, %v2166_v25 }
 0x53c   :  { %v2174_v29 = vadd.f32 %v2173_v24, %v2169_v28 }
 0x53e   :  { %v2176_v30 = vsel %vm2175_vm8, %v2174_v29, 0.0 }
 0x53f   :  { %2177 = vadd.xlane.f32.xlu1 %v2176_v30 }
 0x5cc   :  { %v2178_v31 = vpop.xlane.xlu1 %2177 }
 0x5cd   :  { %v2179_v32 = vmul.f32 0.03125, %v2178_v31 }
 0x5cf   :  { %v2180_v33 = vsub.f32 %v2174_v29, %v2179_v32 }
 0x5d1   :  { %v2181_v34 = vmul.f32 %v2180_v33, %v2180_v33 }
 0x5d3   :  { %v2182_v35 = vsel %vm2175_vm8, %v2181_v34, 0.0 }
 0x5d4   :  { %2183 = vadd.xlane.f32.xlu0 %v2182_v35 }
 0x661   :  { %v2184_v37 = vpop.xlane.xlu0 %2183 }
 0x662   :  { %v2185_v38 = vmul.f32 0.03125, %v2184_v37 }
 0x664   :  { %v2186_v39 = vadd.f32 1e-05, %v2185_v38 }
 0x666   :  { %2874 = vrsqrt.f32 %v2186_v39 }
 0x670   :  { %v2875_v43 = vpop.eup %2874 }
 0x671   :  { %v2188_v44 = vmul.f32 %v2875_v43, %v2180_v33 }
 0x673   :  { %v2193_v46 = vmul.f32 %v2192_v42, %v2188_v44 }
 0x675   :  { %v2198_v47 = vadd.f32 %v2197_v45, %v2193_v46 }
 0x677   :  { %2876 = vtanh.f32 %v2198_v47 }
 0x681   :  { %v2877_v48 = vpop.eup %2876 }
 0x682   :  { %2200 = vst.msk [vmem:[#allocation2] sm:$0x3] %vm2175_vm8, %v2877_v48 }
 0x683   :  { %2889 = shalt.err (!%p2886_p4)
}
 0x684   :  { %s2890_s22 = scalar_lea.hbm %s3415_s6, 32 }
 0x685   :  { %p2891_p5 = scmp.ne.s32.totalorder %s3415_s6, %s2890_s22  ;;  %p2894_p6 = scmp.lt.u32.totalorder %s2890_s22, %s3415_s6 }
 0x687   :  { %p2896_p7 = pnand %p2894_p6, %p2891_p5 }
 0x689   :  { %2899 = shalt.err (!%p2896_p7)
}
 0x68a   :  { %2210 = dma.vmem_to_hbm [thread:$0]  %s2208_s19, 32, %s3415_s6, [#allocation3]  }
 0x68b   :  { %2900 = dma.done.wait [#allocation3], 32  }
 0x68c   :  { %2901 = vsyncadd [#allocation3], 4294967264 }
 0x68d   :  { %2214 = vsyncpa [#allocation3], 1 }

</bundles_post_ra>
